<compile_context>
chip_gen: v7x
topology: tpu7x:2x2x1
jax: 0.10.0
libtpu: 0.0.40
codegen_flags: <defaults>
</compile_context>

<pallas_src>
import functools
import math

import jax
import jax.numpy as jnp
from jax.experimental import pallas as pl
from jax.experimental.pallas import tpu as pltpu


# ------------------------------ fused kernel -------------------------------- #

def _fused_layer_kernel(x_ref, in_w_ref, in_b_ref,
                        wqkv_ref, bqkv_ref, wo_ref, bo_ref,
                        w1_ref, b1_ref, w2_ref, b2_ref,
                        ln1_g_ref, ln1_b_ref, ln2_g_ref, ln2_b_ref,
                        dec_w_ref, dec_b_ref,
                        o_ref,
                        h_scratch,
                        *, num_layers, num_heads, n_seq, seq, eps, ffn_chunk):
    """Grid = (batch_tile, layer). One encoder layer per invocation.

    h_scratch (rows, D) f32 carries the activation across the layer axis.
    Per-layer weight refs already point at layer `l` (streamed via BlockSpec).
    """
    l = pl.program_id(1)
    cdt = wqkv_ref.dtype                      # MXU operand dtype (f32 or bf16)

    # ---- first layer iteration: input projection (once per row block) ------
    @pl.when(l == 0)
    def _():
        x = x_ref[...]
        h0 = jnp.dot(x.astype(in_w_ref.dtype), in_w_ref[...],
                     preferred_element_type=jnp.float32) + in_b_ref[...]
        h_scratch[...] = h0

    h = h_scratch[...]                        # (rows, D) f32
    rows, D = h.shape
    dh = D // num_heads

    # ---- self attention (1/sqrt(dh) already folded into Wq at pack time) ---
    qkv = jnp.dot(h.astype(cdt), wqkv_ref[...],
                  preferred_element_type=jnp.float32) + bqkv_ref[...]
    q = qkv[:, :D]
    k = qkv[:, D:2 * D]
    v = qkv[:, 2 * D:]

    sa_parts = []
    for s in range(n_seq):                    # whole sequences in this block
        r0 = s * seq
        qb = q[r0:r0 + seq]
        kb = k[r0:r0 + seq]
        vb = v[r0:r0 + seq]
        sa_seq = jnp.zeros((seq, D), jnp.float32)
        for hh in range(num_heads):
            c0 = hh * dh
            qh = qb[:, c0:c0 + dh]
            kh = kb[:, c0:c0 + dh]
            vh = vb[:, c0:c0 + dh]
            scores = jax.lax.dot_general(
                qh.astype(cdt), kh.astype(cdt), (((1,), (1,)), ((), ())),
                preferred_element_type=jnp.float32)               # (S, S)
            m = jnp.max(scores, axis=-1, keepdims=True)
            p = jnp.exp(scores - m)
            denom = jnp.sum(p, axis=-1, keepdims=True)
            p = p * pl.reciprocal(denom, approx=True)
            head_out = jnp.dot(p.astype(cdt), vh.astype(cdt),
                               preferred_element_type=jnp.float32)  # (S, dh)
            # Contract head output directly against the matching Wo row-slice:
            # lane-dense MXU work, no masked partial stores, no scratch trip.
            sa_seq = sa_seq + jnp.dot(head_out.astype(cdt),
                                      wo_ref[c0:c0 + dh, :],
                                      preferred_element_type=jnp.float32)
        sa_parts.append(sa_seq)
    sa = sa_parts[0] if n_seq == 1 else jnp.concatenate(sa_parts, axis=0)
    sa = sa + bo_ref[...]

    # ---- residual + LayerNorm1 (post-norm; f32 statistics) -----------------
    h1 = h + sa
    mu1 = jnp.mean(h1, axis=-1, keepdims=True)
    var1 = jnp.mean((h1 - mu1) ** 2, axis=-1, keepdims=True)
    h1 = (h1 - mu1) * jax.lax.rsqrt(var1 + eps) * ln1_g_ref[...] + ln1_b_ref[...]

    # ---- feed-forward: linear1 -> relu -> linear2 (chunked over dim_ff) ----
    dim_ff = w1_ref.shape[-1]
    h1c = h1.astype(cdt)
    f_out = jnp.zeros((rows, D), jnp.float32)
    for cf0 in range(0, dim_ff, ffn_chunk):
        cf1 = min(cf0 + ffn_chunk, dim_ff)
        f = jnp.dot(h1c, w1_ref[:, cf0:cf1],
                    preferred_element_type=jnp.float32) + b1_ref[:, cf0:cf1]
        f = jnp.maximum(f, 0.0)
        f_out = f_out + jnp.dot(f.astype(cdt), w2_ref[cf0:cf1, :],
                                preferred_element_type=jnp.float32)
    f_out = f_out + b2_ref[...]

    # ---- residual + LayerNorm2 ----------------------------------------------
    h2 = h1 + f_out
    mu2 = jnp.mean(h2, axis=-1, keepdims=True)
    var2 = jnp.mean((h2 - mu2) ** 2, axis=-1, keepdims=True)
    h_new = (h2 - mu2) * jax.lax.rsqrt(var2 + eps) * ln2_g_ref[...] + ln2_b_ref[...]

    h_scratch[...] = h_new

    # ---- last layer iteration: decoder linear (lane-dense padded output) ---
    @pl.when(l == num_layers - 1)
    def _():
        out = jnp.dot(h_new.astype(dec_w_ref.dtype), dec_w_ref[...],
                      preferred_element_type=jnp.float32) + dec_b_ref[...]
        o_ref[...] = out.astype(o_ref.dtype)


# ------------------------------ wrapper ------------------------------------- #

def pack_params(params, num_heads, dtype=jnp.float32):
    """One-time packing: stack layers, pack QKV (with folded softmax scale),
    pad decoder to a lane-dense width, cast matmul weights to `dtype`
    (biases / LayerNorm params stay f32)."""
    layers = params["layers"]
    d_model = params["in_w"].shape[1]
    out_size = params["dec_w"].shape[1]
    out_pad = ((out_size + 127) // 128) * 128
    dh = d_model // num_heads
    scale = 1.0 / math.sqrt(dh)

    def stack(name):
        return jnp.stack([lp[name] for lp in layers], axis=0)

    wqkv = jnp.stack([jnp.concatenate([lp["wq"] * scale, lp["wk"], lp["wv"]],
                                      axis=1) for lp in layers], axis=0)
    bqkv = jnp.stack([jnp.concatenate([lp["bq"] * scale, lp["bk"], lp["bv"]],
                                      axis=1) for lp in layers], axis=0)
    dec_w = jnp.zeros((d_model, out_pad), jnp.float32
                      ).at[:, :out_size].set(params["dec_w"])
    dec_b = jnp.zeros((1, out_pad), jnp.float32
                      ).at[:, :out_size].set(params["dec_b"])

    f32 = jnp.float32
    return {
        "in_w": params["in_w"].astype(dtype), "in_b": params["in_b"].astype(f32),
        "wqkv": wqkv.astype(dtype), "bqkv": bqkv.astype(f32),       # (L, D, 3D) / (L, 1, 3D)
        "wo": stack("wo").astype(dtype), "bo": stack("bo").astype(f32),
        "w1": stack("w1").astype(dtype), "b1": stack("b1").astype(f32),
        "w2": stack("w2").astype(dtype), "b2": stack("b2").astype(f32),
        "ln1_g": stack("ln1_g").astype(f32), "ln1_b": stack("ln1_b").astype(f32),
        "ln2_g": stack("ln2_g").astype(f32), "ln2_b": stack("ln2_b").astype(f32),
        "dec_w": dec_w.astype(dtype), "dec_b": dec_b,
    }


def _vmem_limit_bytes(packed, rows, fin, out_pad):
    """Resident globals + 2x (double-buffered) one-layer weights + row blocks
    + scratch, doubled for compiler scratch/spill headroom, capped for v7x."""
    def nbytes(a):
        return a.size * a.dtype.itemsize
    resident = sum(nbytes(packed[k]) for k in ("in_w", "in_b", "dec_w", "dec_b"))
    num_layers = packed["wqkv"].shape[0]
    per_layer = sum(nbytes(packed[k]) // num_layers for k in
                    ("wqkv", "bqkv", "wo", "bo", "w1", "b1", "w2", "b2",
                     "ln1_g", "ln1_b", "ln2_g", "ln2_b"))
    io = 2 * 4 * rows * (fin + out_pad)
    scratch = 4 * rows * packed["in_w"].shape[1]
    total = resident + 2 * per_layer + io + scratch
    return int(min(max(2 * total, 16 << 20) + (8 << 20), 64 << 20))


def transformer_regressor_forward(x, padding_mask, packed, *, num_heads,
                                  out_size, seqs_per_block=1, eps=1e-5,
                                  ffn_chunk=512):
    # padding_mask is intentionally unused: the PyTorch _sa_block drops it.
    del padding_mask
    B, S, Fin = x.shape
    D = packed["in_w"].shape[1]
    L = packed["wqkv"].shape[0]
    out_pad = packed["dec_w"].shape[1]
    assert D % num_heads == 0, "d_model must be divisible by n_head"
    assert B % seqs_per_block == 0
    rows = seqs_per_block * S
    assert rows % 8 == 0, "rows per grid step must be a multiple of 8"
    n_b = B // seqs_per_block

    x2d = x.reshape(B * S, Fin)

    def const_spec(a):          # layer-invariant, fully resident weight
        return pl.BlockSpec(a.shape, lambda b, l, nd=a.ndim: (0,) * nd)

    def layer_spec(a):          # streamed: grid axis 1 selects the layer
        return pl.BlockSpec((None,) + a.shape[1:],
                            lambda b, l, nd=a.ndim: (l,) + (0,) * (nd - 1))

    in_specs = [
        pl.BlockSpec((rows, Fin), lambda b, l: (b, 0)),             # x rows
        const_spec(packed["in_w"]), const_spec(packed["in_b"]),
        layer_spec(packed["wqkv"]), layer_spec(packed["bqkv"]),
        layer_spec(packed["wo"]), layer_spec(packed["bo"]),
        layer_spec(packed["w1"]), layer_spec(packed["b1"]),
        layer_spec(packed["w2"]), layer_spec(packed["b2"]),
        layer_spec(packed["ln1_g"]), layer_spec(packed["ln1_b"]),
        layer_spec(packed["ln2_g"]), layer_spec(packed["ln2_b"]),
        const_spec(packed["dec_w"]), const_spec(packed["dec_b"]),
    ]
    out_spec = pl.BlockSpec((rows, out_pad), lambda b, l: (b, 0))

    kernel = functools.partial(
        _fused_layer_kernel, num_layers=L, num_heads=num_heads,
        n_seq=seqs_per_block, seq=S, eps=eps,
        ffn_chunk=min(ffn_chunk, packed["w1"].shape[-1]))

    out2d = pl.pallas_call(
        kernel,
        out_shape=jax.ShapeDtypeStruct((B * S, out_pad), x.dtype),
        grid_spec=pltpu.PrefetchScalarGridSpec(
            num_scalar_prefetch=0,
            grid=(n_b, L),                       # (batch tiles, layers)
            in_specs=in_specs,
            out_specs=out_spec,
            scratch_shapes=[pltpu.VMEM((rows, D), jnp.float32)]),
        compiler_params=pltpu.CompilerParams(
            dimension_semantics=("parallel", "arbitrary"),
            vmem_limit_bytes=_vmem_limit_bytes(packed, rows, Fin, out_pad)),
    )(x2d, packed["in_w"], packed["in_b"],
      packed["wqkv"], packed["bqkv"], packed["wo"], packed["bo"],
      packed["w1"], packed["b1"], packed["w2"], packed["b2"],
      packed["ln1_g"], packed["ln1_b"], packed["ln2_g"], packed["ln2_b"],
      packed["dec_w"], packed["dec_b"])

    # out_size is a static Python int (bound via functools.partial) -> static slice.
    return out2d[:, :out_size].reshape(B, S, out_size)


# --------------------------- pure-JAX reference ------------------------------ #

def _ref_forward(x, params, num_heads, eps=1e-5):
    def lin(h, w, b):
        return h @ w + b[0]

    def layernorm(h, g, b):
        mu = jnp.mean(h, axis=-1, keepdims=True)
        var = jnp.mean((h - mu) ** 2, axis=-1, keepdims=True)
        return (h - mu) * jax.lax.rsqrt(var + eps) * g[0] + b[0]

    h = lin(x, params["in_w"], params["in_b"])
    B, S, D = h.shape
    dh = D // num_heads
    for lp in params["layers"]:
        q = lin(h, lp["wq"], lp["bq"]).reshape(B, S, num_heads, dh).transpose(0, 2, 1, 3)
        k = lin(h, lp["wk"], lp["bk"]).reshape(B, S, num_heads, dh).transpose(0, 2, 1, 3)
        v = lin(h, lp["wv"], lp["bv"]).reshape(B, S, num_heads, dh).transpose(0, 2, 1, 3)
        scores = jnp.einsum("bhqd,bhkd->bhqk", q, k) / math.sqrt(dh)
        p = jax.nn.softmax(scores, axis=-1)
        attn = jnp.einsum("bhqk,bhkd->bhqd", p, v).transpose(0, 2, 1, 3).reshape(B, S, D)
        sa = lin(attn, lp["wo"], lp["bo"])
        h = layernorm(h + sa, lp["ln1_g"], lp["ln1_b"])
        f = lin(jnp.maximum(lin(h, lp["w1"], lp["b1"]), 0.0), lp["w2"], lp["b2"])
        h = layernorm(h + f, lp["ln2_g"], lp["ln2_b"])
    return lin(h, params["dec_w"], params["dec_b"])


# --------------------------------- main -------------------------------------- #

def _init_params(key, num_layers, input_size, d_model, dim_ff, output_size):
    def nrm(k, shape, scale=0.05):
        return scale * jax.random.normal(k, shape, dtype=jnp.float32)

    keys = jax.random.split(key, 4 + num_layers)
    params = {
        "in_w": nrm(keys[0], (input_size, d_model)),
        "in_b": nrm(keys[1], (1, d_model)),
        "dec_w": nrm(keys[2], (d_model, output_size)),
        "dec_b": nrm(keys[3], (1, output_size)),
        "layers": [],
    }
    for li in range(num_layers):
        lk = jax.random.split(keys[4 + li], 12)
        params["layers"].append({
            "wq": nrm(lk[0], (d_model, d_model)), "bq": nrm(lk[1], (1, d_model)),
            "wk": nrm(lk[2], (d_model, d_model)), "bk": nrm(lk[3], (1, d_model)),
            "wv": nrm(lk[4], (d_model, d_model)), "bv": nrm(lk[5], (1, d_model)),
            "wo": nrm(lk[6], (d_model, d_model)), "bo": nrm(lk[7], (1, d_model)),
            "w1": nrm(lk[8], (d_model, dim_ff)), "b1": nrm(lk[9], (1, dim_ff)),
            "w2": nrm(lk[10], (dim_ff, d_model)), "b2": nrm(lk[11], (1, d_model)),
            "ln1_g": jnp.ones((1, d_model), jnp.float32),
            "ln1_b": jnp.zeros((1, d_model), jnp.float32),
            "ln2_g": jnp.ones((1, d_model), jnp.float32),
            "ln2_b": jnp.zeros((1, d_model), jnp.float32),
        })
    return params


if __name__ == "__main__":
    # Small config consistent with the module's constructor signature.
    num_encoder_layers = 2
    d_model = 32
    n_head = 4
    input_size = 4       # e.g. 3D hit coordinates + 1
    output_size = 20     # 20 track classes (per docstring)
    dim_feedforward = 64
    B, S = 2, 8

    key = jax.random.PRNGKey(0)
    k_x, k_p = jax.random.split(key)
    x = jax.random.normal(k_x, (B, S, input_size), dtype=jnp.float32)
    padding_mask = jnp.zeros((B, S), dtype=jnp.bool_)   # unused (as in PyTorch forward)
    params = _init_params(k_p, num_encoder_layers, input_size, d_model,
                          dim_feedforward, output_size)

    ref = _ref_forward(x, params, n_head)

    # --- f32 MXU-operand path (exactness check; also the v5e-friendly path) ---
    packed_f32 = pack_params(params, n_head, dtype=jnp.float32)
    fwd_f32 = jax.jit(functools.partial(
        transformer_regressor_forward, num_heads=n_head,
        out_size=output_size, seqs_per_block=1))
    out = jax.block_until_ready(fwd_f32(x, padding_mask, packed_f32))
    assert out.shape == (B, S, output_size)
    # tolerance slightly relaxed vs f32-exact because softmax uses the EUP
    # approximate reciprocal (pl.reciprocal(approx=True)).
    assert jnp.allclose(out, ref, atol=2e-3, rtol=2e-3), \
        "Pallas (f32 operands) output mismatch vs JAX reference"

    # --- bf16 MXU-operand path (v6e / v7x deployment dtype) -------------------
    packed_bf16 = pack_params(params, n_head, dtype=jnp.bfloat16)
    fwd_bf16 = jax.jit(functools.partial(
        transformer_regressor_forward, num_heads=n_head,
        out_size=output_size, seqs_per_block=1))
    out_bf16 = jax.block_until_ready(fwd_bf16(x, padding_mask, packed_bf16))
    assert out_bf16.shape == (B, S, output_size)
    assert jnp.allclose(out_bf16, ref, atol=1e-1, rtol=1e-1), \
        "Pallas (bf16 operands) output mismatch vs JAX reference"

    # TODO(synk): for S not a multiple of 8 or ragged sequences, pad the row
    # block and mask the attention scores (padding_mask is dropped here to
    # match the PyTorch _sa_block semantics).
    print("KERNEL_OK")
</pallas_src>

<mosaic_0001>
module attributes {stable_mosaic.version = 11 : i64} {
  func.func @_fused_layer_kernel(%arg0: i32, %arg1: i32, %arg2: memref<8x4xf32, #tpu.memory_space<vmem>>, %arg3: memref<4x32xf32, #tpu.memory_space<vmem>>, %arg4: memref<1x32xf32, #tpu.memory_space<vmem>>, %arg5: memref<1x32x96xf32, #tpu.memory_space<vmem>>, %arg6: memref<1x1x96xf32, #tpu.memory_space<vmem>>, %arg7: memref<1x32x32xf32, #tpu.memory_space<vmem>>, %arg8: memref<1x1x32xf32, #tpu.memory_space<vmem>>, %arg9: memref<1x32x64xf32, #tpu.memory_space<vmem>>, %arg10: memref<1x1x64xf32, #tpu.memory_space<vmem>>, %arg11: memref<1x64x32xf32, #tpu.memory_space<vmem>>, %arg12: memref<1x1x32xf32, #tpu.memory_space<vmem>>, %arg13: memref<1x1x32xf32, #tpu.memory_space<vmem>>, %arg14: memref<1x1x32xf32, #tpu.memory_space<vmem>>, %arg15: memref<1x1x32xf32, #tpu.memory_space<vmem>>, %arg16: memref<1x1x32xf32, #tpu.memory_space<vmem>>, %arg17: memref<32x128xf32, #tpu.memory_space<vmem>>, %arg18: memref<1x128xf32, #tpu.memory_space<vmem>>, %arg19: memref<8x128xf32, #tpu.memory_space<vmem>>, %arg20: memref<8x32xf32, #tpu.memory_space<vmem>>) attributes {dimension_semantics = [#tpu.dimension_semantics<parallel>, #tpu.dimension_semantics<arbitrary>], iteration_bounds = array<i64: 2, 2>, scalar_prefetch = 0 : i64, scratch_operands = 1 : i64, tpu.core_type = #tpu.core_type<tc>, window_params = [{transform_indices = @transform_0, window_bounds = array<i64: 8, 4>}, {pipeline_mode = #tpu.pipeline_mode<synchronous>, transform_indices = @transform_1, window_bounds = array<i64: 4, 32>}, {pipeline_mode = #tpu.pipeline_mode<synchronous>, transform_indices = @transform_2, window_bounds = array<i64: 1, 32>}, {transform_indices = @transform_3, window_bounds = array<i64: 1, 32, 96>}, {transform_indices = @transform_4, window_bounds = array<i64: 1, 1, 96>}, {transform_indices = @transform_5, window_bounds = array<i64: 1, 32, 32>}, {transform_indices = @transform_6, window_bounds = array<i64: 1, 1, 32>}, {transform_indices = @transform_7, window_bounds = array<i64: 1, 32, 64>}, {transform_indices = @transform_8, window_bounds = array<i64: 1, 1, 64>}, {transform_indices = @transform_9, window_bounds = array<i64: 1, 64, 32>}, {transform_indices = @transform_10, window_bounds = array<i64: 1, 1, 32>}, {transform_indices = @transform_11, window_bounds = array<i64: 1, 1, 32>}, {transform_indices = @transform_12, window_bounds = array<i64: 1, 1, 32>}, {transform_indices = @transform_13, window_bounds = array<i64: 1, 1, 32>}, {transform_indices = @transform_14, window_bounds = array<i64: 1, 1, 32>}, {pipeline_mode = #tpu.pipeline_mode<synchronous>, transform_indices = @transform_15, window_bounds = array<i64: 32, 128>}, {pipeline_mode = #tpu.pipeline_mode<synchronous>, transform_indices = @transform_16, window_bounds = array<i64: 1, 128>}, {transform_indices = @transform_17, window_bounds = array<i64: 8, 128>}]} {
    %c0_i32 = arith.constant 0 : i32
    %0 = arith.cmpi eq, %arg1, %c0_i32 : i32
    %1 = arith.extui %0 : i1 to i32
    %c0_i32_0 = arith.constant 0 : i32
    %2 = arith.cmpi ne, %1, %c0_i32_0 : i32
    scf.if %2 {
      %c0_82 = arith.constant 0 : index
      %c0_83 = arith.constant 0 : index
      %171 = vector.load %arg2[%c0_82, %c0_83] : memref<8x4xf32, #tpu.memory_space<vmem>>, vector<8x4xf32>
      %c0_84 = arith.constant 0 : index
      %c0_85 = arith.constant 0 : index
      %172 = vector.load %arg3[%c0_84, %c0_85] : memref<4x32xf32, #tpu.memory_space<vmem>>, vector<4x32xf32>
      %cst_86 = arith.constant dense<0.000000e+00> : vector<8x32xf32>
      %173 = tpu.matmul %171, %172, %cst_86 {dimension_numbers = #tpu.dot_dimension_numbers<[1], [0], [0], [1], [0, 0, 1, 1], [], []>} : vector<8x4xf32>, vector<4x32xf32>, vector<8x32xf32> -> vector<8x32xf32>
      %c0_87 = arith.constant 0 : index
      %c0_88 = arith.constant 0 : index
      %174 = vector.load %arg4[%c0_87, %c0_88] : memref<1x32xf32, #tpu.memory_space<vmem>>, vector<1x32xf32>
      %175 = vector.broadcast %174 : vector<1x32xf32> to vector<8x32xf32>
      %176 = arith.addf %173, %175 : vector<8x32xf32>
      %c0_89 = arith.constant 0 : index
      %c0_90 = arith.constant 0 : index
      %177 = vector.load %arg20[%c0_89, %c0_90] : memref<8x32xf32, #tpu.memory_space<vmem>>, vector<8x32xf32>
      tpu.vector_store %arg20[%c0_89, %c0_90], %176 {strides = array<i32>} : memref<8x32xf32, #tpu.memory_space<vmem>>, vector<8x32xf32>,
    } else {
    }
    %c0 = arith.constant 0 : index
    %c0_1 = arith.constant 0 : index
    %3 = vector.load %arg20[%c0, %c0_1] : memref<8x32xf32, #tpu.memory_space<vmem>>, vector<8x32xf32>
    %c0_2 = arith.constant 0 : index
    %c0_3 = arith.constant 0 : index
    %c0_4 = arith.constant 0 : index
    %4 = vector.load %arg5[%c0_2, %c0_3, %c0_4] : memref<1x32x96xf32, #tpu.memory_space<vmem>>, vector<1x32x96xf32>
    %5 = vector.shape_cast %4 : vector<1x32x96xf32> to vector<32x96xf32>
    %cst = arith.constant dense<0.000000e+00> : vector<8x96xf32>
    %6 = tpu.matmul %3, %5, %cst {dimension_numbers = #tpu.dot_dimension_numbers<[1], [0], [0], [1], [0, 0, 1, 1], [], []>} : vector<8x32xf32>, vector<32x96xf32>, vector<8x96xf32> -> vector<8x96xf32>
    %c0_5 = arith.constant 0 : index
    %c0_6 = arith.constant 0 : index
    %c0_7 = arith.constant 0 : index
    %7 = vector.load %arg6[%c0_5, %c0_6, %c0_7] : memref<1x1x96xf32, #tpu.memory_space<vmem>>, vector<1x1x96xf32>
    %8 = vector.shape_cast %7 : vector<1x1x96xf32> to vector<1x96xf32>
    %9 = vector.broadcast %8 : vector<1x96xf32> to vector<8x96xf32>
    %10 = arith.addf %6, %9 : vector<8x96xf32>
    %11 = vector.extract_strided_slice %10 {offsets = [0, 0], sizes = [8, 32], strides = [1, 1]} : vector<8x96xf32> to vector<8x32xf32>
    %12 = vector.extract_strided_slice %10 {offsets = [0, 32], sizes = [8, 32], strides = [1, 1]} : vector<8x96xf32> to vector<8x32xf32>
    %13 = vector.extract_strided_slice %10 {offsets = [0, 64], sizes = [8, 32], strides = [1, 1]} : vector<8x96xf32> to vector<8x32xf32>
    %cst_8 = arith.constant 0.000000e+00 : f32
    %14 = vector.broadcast %cst_8 : f32 to vector<8x32xf32>
    %15 = vector.extract_strided_slice %11 {offsets = [0, 0], sizes = [8, 8], strides = [1, 1]} : vector<8x32xf32> to vector<8x8xf32>
    %16 = vector.extract_strided_slice %12 {offsets = [0, 0], sizes = [8, 8], strides = [1, 1]} : vector<8x32xf32> to vector<8x8xf32>
    %17 = vector.extract_strided_slice %13 {offsets = [0, 0], sizes = [8, 8], strides = [1, 1]} : vector<8x32xf32> to vector<8x8xf32>
    %cst_9 = arith.constant dense<0.000000e+00> : vector<8x8xf32>
    %18 = tpu.matmul %15, %16, %cst_9 {dimension_numbers = #tpu.dot_dimension_numbers<[1], [1], [0], [0], [0, 0, 1, 0], [], []>} : vector<8x8xf32>, vector<8x8xf32>, vector<8x8xf32> -> vector<8x8xf32>
    %cst_10 = arith.constant dense<0xFF800000> : vector<8xf32>
    %19 = vector.multi_reduction <maximumf>, %18, %cst_10 [1] : vector<8x8xf32> to vector<8xf32>
    %20 = vector.shape_cast %19 : vector<8xf32> to vector<8x1xf32>
    %21 = vector.broadcast %20 : vector<8x1xf32> to vector<8x8xf32>
    %22 = arith.subf %18, %21 : vector<8x8xf32>
    %23 = math.exp %22 : vector<8x8xf32>
    %cst_11 = arith.constant dense<0.000000e+00> : vector<8xf32>
    %24 = vector.multi_reduction <add>, %23, %cst_11 [1] : vector<8x8xf32> to vector<8xf32>
    %25 = vector.shape_cast %24 : vector<8xf32> to vector<8x1xf32>
    %26 = tpu.reciprocal %25 {approx = true} : vector<8x1xf32> -> vector<8x1xf32>
    %27 = vector.broadcast %26 : vector<8x1xf32> to vector<8x8xf32>
    %28 = arith.mulf %23, %27 : vector<8x8xf32>
    %cst_12 = arith.constant dense<0.000000e+00> : vector<8x8xf32>
    %29 = tpu.matmul %28, %17, %cst_12 {dimension_numbers = #tpu.dot_dimension_numbers<[1], [0], [0], [1], [0, 0, 1, 1], [], []>} : vector<8x8xf32>, vector<8x8xf32>, vector<8x8xf32> -> vector<8x8xf32>
    %c0_13 = arith.constant 0 : index
    %c0_14 = arith.constant 0 : index
    %c0_15 = arith.constant 0 : index
    %30 = vector.load %arg7[%c0_13, %c0_14, %c0_15] : memref<1x32x32xf32, #tpu.memory_space<vmem>>, vector<1x8x32xf32>
    %31 = vector.shape_cast %30 : vector<1x8x32xf32> to vector<8x32xf32>
    %cst_16 = arith.constant dense<0.000000e+00> : vector<8x32xf32>
    %32 = tpu.matmul %29, %31, %cst_16 {dimension_numbers = #tpu.dot_dimension_numbers<[1], [0], [0], [1], [0, 0, 1, 1], [], []>} : vector<8x8xf32>, vector<8x32xf32>, vector<8x32xf32> -> vector<8x32xf32>
    %33 = arith.addf %14, %32 : vector<8x32xf32>
    %34 = vector.extract_strided_slice %11 {offsets = [0, 8], sizes = [8, 8], strides = [1, 1]} : vector<8x32xf32> to vector<8x8xf32>
    %35 = vector.extract_strided_slice %12 {offsets = [0, 8], sizes = [8, 8], strides = [1, 1]} : vector<8x32xf32> to vector<8x8xf32>
    %36 = vector.extract_strided_slice %13 {offsets = [0, 8], sizes = [8, 8], strides = [1, 1]} : vector<8x32xf32> to vector<8x8xf32>
    %cst_17 = arith.constant dense<0.000000e+00> : vector<8x8xf32>
    %37 = tpu.matmul %34, %35, %cst_17 {dimension_numbers = #tpu.dot_dimension_numbers<[1], [1], [0], [0], [0, 0, 1, 0], [], []>} : vector<8x8xf32>, vector<8x8xf32>, vector<8x8xf32> -> vector<8x8xf32>
    %cst_18 = arith.constant dense<0xFF800000> : vector<8xf32>
    %38 = vector.multi_reduction <maximumf>, %37, %cst_18 [1] : vector<8x8xf32> to vector<8xf32>
    %39 = vector.shape_cast %38 : vector<8xf32> to vector<8x1xf32>
    %40 = vector.broadcast %39 : vector<8x1xf32> to vector<8x8xf32>
    %41 = arith.subf %37, %40 : vector<8x8xf32>
    %42 = math.exp %41 : vector<8x8xf32>
    %cst_19 = arith.constant dense<0.000000e+00> : vector<8xf32>
    %43 = vector.multi_reduction <add>, %42, %cst_19 [1] : vector<8x8xf32> to vector<8xf32>
    %44 = vector.shape_cast %43 : vector<8xf32> to vector<8x1xf32>
    %45 = tpu.reciprocal %44 {approx = true} : vector<8x1xf32> -> vector<8x1xf32>
    %46 = vector.broadcast %45 : vector<8x1xf32> to vector<8x8xf32>
    %47 = arith.mulf %42, %46 : vector<8x8xf32>
    %cst_20 = arith.constant dense<0.000000e+00> : vector<8x8xf32>
    %48 = tpu.matmul %47, %36, %cst_20 {dimension_numbers = #tpu.dot_dimension_numbers<[1], [0], [0], [1], [0, 0, 1, 1], [], []>} : vector<8x8xf32>, vector<8x8xf32>, vector<8x8xf32> -> vector<8x8xf32>
    %c0_21 = arith.constant 0 : index
    %c8 = arith.constant 8 : index
    %c0_22 = arith.constant 0 : index
    %49 = vector.load %arg7[%c0_21, %c8, %c0_22] : memref<1x32x32xf32, #tpu.memory_space<vmem>>, vector<1x8x32xf32>
    %50 = vector.shape_cast %49 : vector<1x8x32xf32> to vector<8x32xf32>
    %cst_23 = arith.constant dense<0.000000e+00> : vector<8x32xf32>
    %51 = tpu.matmul %48, %50, %cst_23 {dimension_numbers = #tpu.dot_dimension_numbers<[1], [0], [0], [1], [0, 0, 1, 1], [], []>} : vector<8x8xf32>, vector<8x32xf32>, vector<8x32xf32> -> vector<8x32xf32>
    %52 = arith.addf %33, %51 : vector<8x32xf32>
    %53 = vector.extract_strided_slice %11 {offsets = [0, 16], sizes = [8, 8], strides = [1, 1]} : vector<8x32xf32> to vector<8x8xf32>
    %54 = vector.extract_strided_slice %12 {offsets = [0, 16], sizes = [8, 8], strides = [1, 1]} : vector<8x32xf32> to vector<8x8xf32>
    %55 = vector.extract_strided_slice %13 {offsets = [0, 16], sizes = [8, 8], strides = [1, 1]} : vector<8x32xf32> to vector<8x8xf32>
    %cst_24 = arith.constant dense<0.000000e+00> : vector<8x8xf32>
    %56 = tpu.matmul %53, %54, %cst_24 {dimension_numbers = #tpu.dot_dimension_numbers<[1], [1], [0], [0], [0, 0, 1, 0], [], []>} : vector<8x8xf32>, vector<8x8xf32>, vector<8x8xf32> -> vector<8x8xf32>
    %cst_25 = arith.constant dense<0xFF800000> : vector<8xf32>
    %57 = vector.multi_reduction <maximumf>, %56, %cst_25 [1] : vector<8x8xf32> to vector<8xf32>
    %58 = vector.shape_cast %57 : vector<8xf32> to vector<8x1xf32>
    %59 = vector.broadcast %58 : vector<8x1xf32> to vector<8x8xf32>
    %60 = arith.subf %56, %59 : vector<8x8xf32>
    %61 = math.exp %60 : vector<8x8xf32>
    %cst_26 = arith.constant dense<0.000000e+00> : vector<8xf32>
    %62 = vector.multi_reduction <add>, %61, %cst_26 [1] : vector<8x8xf32> to vector<8xf32>
    %63 = vector.shape_cast %62 : vector<8xf32> to vector<8x1xf32>
    %64 = tpu.reciprocal %63 {approx = true} : vector<8x1xf32> -> vector<8x1xf32>
    %65 = vector.broadcast %64 : vector<8x1xf32> to vector<8x8xf32>
    %66 = arith.mulf %61, %65 : vector<8x8xf32>
    %cst_27 = arith.constant dense<0.000000e+00> : vector<8x8xf32>
    %67 = tpu.matmul %66, %55, %cst_27 {dimension_numbers = #tpu.dot_dimension_numbers<[1], [0], [0], [1], [0, 0, 1, 1], [], []>} : vector<8x8xf32>, vector<8x8xf32>, vector<8x8xf32> -> vector<8x8xf32>
    %c0_28 = arith.constant 0 : index
    %c16 = arith.constant 16 : index
    %c0_29 = arith.constant 0 : index
    %68 = vector.load %arg7[%c0_28, %c16, %c0_29] : memref<1x32x32xf32, #tpu.memory_space<vmem>>, vector<1x8x32xf32>
    %69 = vector.shape_cast %68 : vector<1x8x32xf32> to vector<8x32xf32>
    %cst_30 = arith.constant dense<0.000000e+00> : vector<8x32xf32>
    %70 = tpu.matmul %67, %69, %cst_30 {dimension_numbers = #tpu.dot_dimension_numbers<[1], [0], [0], [1], [0, 0, 1, 1], [], []>} : vector<8x8xf32>, vector<8x32xf32>, vector<8x32xf32> -> vector<8x32xf32>
    %71 = arith.addf %52, %70 : vector<8x32xf32>
    %72 = vector.extract_strided_slice %11 {offsets = [0, 24], sizes = [8, 8], strides = [1, 1]} : vector<8x32xf32> to vector<8x8xf32>
    %73 = vector.extract_strided_slice %12 {offsets = [0, 24], sizes = [8, 8], strides = [1, 1]} : vector<8x32xf32> to vector<8x8xf32>
    %74 = vector.extract_strided_slice %13 {offsets = [0, 24], sizes = [8, 8], strides = [1, 1]} : vector<8x32xf32> to vector<8x8xf32>
    %cst_31 = arith.constant dense<0.000000e+00> : vector<8x8xf32>
    %75 = tpu.matmul %72, %73, %cst_31 {dimension_numbers = #tpu.dot_dimension_numbers<[1], [1], [0], [0], [0, 0, 1, 0], [], []>} : vector<8x8xf32>, vector<8x8xf32>, vector<8x8xf32> -> vector<8x8xf32>
    %cst_32 = arith.constant dense<0xFF800000> : vector<8xf32>
    %76 = vector.multi_reduction <maximumf>, %75, %cst_32 [1] : vector<8x8xf32> to vector<8xf32>
    %77 = vector.shape_cast %76 : vector<8xf32> to vector<8x1xf32>
    %78 = vector.broadcast %77 : vector<8x1xf32> to vector<8x8xf32>
    %79 = arith.subf %75, %78 : vector<8x8xf32>
    %80 = math.exp %79 : vector<8x8xf32>
    %cst_33 = arith.constant dense<0.000000e+00> : vector<8xf32>
    %81 = vector.multi_reduction <add>, %80, %cst_33 [1] : vector<8x8xf32> to vector<8xf32>
    %82 = vector.shape_cast %81 : vector<8xf32> to vector<8x1xf32>
    %83 = tpu.reciprocal %82 {approx = true} : vector<8x1xf32> -> vector<8x1xf32>
    %84 = vector.broadcast %83 : vector<8x1xf32> to vector<8x8xf32>
    %85 = arith.mulf %80, %84 : vector<8x8xf32>
    %cst_34 = arith.constant dense<0.000000e+00> : vector<8x8xf32>
    %86 = tpu.matmul %85, %74, %cst_34 {dimension_numbers = #tpu.dot_dimension_numbers<[1], [0], [0], [1], [0, 0, 1, 1], [], []>} : vector<8x8xf32>, vector<8x8xf32>, vector<8x8xf32> -> vector<8x8xf32>
    %c0_35 = arith.constant 0 : index
    %c24 = arith.constant 24 : index
    %c0_36 = arith.constant 0 : index
    %87 = vector.load %arg7[%c0_35, %c24, %c0_36] : memref<1x32x32xf32, #tpu.memory_space<vmem>>, vector<1x8x32xf32>
    %88 = vector.shape_cast %87 : vector<1x8x32xf32> to vector<8x32xf32>
    %cst_37 = arith.constant dense<0.000000e+00> : vector<8x32xf32>
    %89 = tpu.matmul %86, %88, %cst_37 {dimension_numbers = #tpu.dot_dimension_numbers<[1], [0], [0], [1], [0, 0, 1, 1], [], []>} : vector<8x8xf32>, vector<8x32xf32>, vector<8x32xf32> -> vector<8x32xf32>
    %90 = arith.addf %71, %89 : vector<8x32xf32>
    %c0_38 = arith.constant 0 : index
    %c0_39 = arith.constant 0 : index
    %c0_40 = arith.constant 0 : index
    %91 = vector.load %arg8[%c0_38, %c0_39, %c0_40] : memref<1x1x32xf32, #tpu.memory_space<vmem>>, vector<1x1x32xf32>
    %92 = vector.shape_cast %91 : vector<1x1x32xf32> to vector<1x32xf32>
    %93 = vector.broadcast %92 : vector<1x32xf32> to vector<8x32xf32>
    %94 = arith.addf %90, %93 : vector<8x32xf32>
    %95 = arith.addf %3, %94 : vector<8x32xf32>
    %cst_41 = arith.constant dense<0.000000e+00> : vector<8xf32>
    %96 = vector.multi_reduction <add>, %95, %cst_41 [1] : vector<8x32xf32> to vector<8xf32>
    %97 = vector.shape_cast %96 : vector<8xf32> to vector<8x1xf32>
    %cst_42 = arith.constant 3.200000e+01 : f32
    %98 = vector.broadcast %cst_42 : f32 to vector<8x1xf32>
    %99 = arith.divf %97, %98 : vector<8x1xf32>
    %100 = vector.broadcast %99 : vector<8x1xf32> to vector<8x32xf32>
    %101 = arith.subf %95, %100 : vector<8x32xf32>
    %102 = arith.mulf %101, %101 : vector<8x32xf32>
    %cst_43 = arith.constant dense<0.000000e+00> : vector<8xf32>
    %103 = vector.multi_reduction <add>, %102, %cst_43 [1] : vector<8x32xf32> to vector<8xf32>
    %104 = vector.shape_cast %103 : vector<8xf32> to vector<8x1xf32>
    %cst_44 = arith.constant 3.200000e+01 : f32
    %105 = vector.broadcast %cst_44 : f32 to vector<8x1xf32>
    %106 = arith.divf %104, %105 : vector<8x1xf32>
    %107 = vector.broadcast %99 : vector<8x1xf32> to vector<8x32xf32>
    %108 = arith.subf %95, %107 : vector<8x32xf32>
    %cst_45 = arith.constant 9.99999974E-6 : f32
    %109 = vector.broadcast %cst_45 : f32 to vector<8x1xf32>
    %110 = arith.addf %106, %109 : vector<8x1xf32>
    %111 = math.rsqrt %110 : vector<8x1xf32>
    %112 = vector.broadcast %111 : vector<8x1xf32> to vector<8x32xf32>
    %113 = arith.mulf %108, %112 : vector<8x32xf32>
    %c0_46 = arith.constant 0 : index
    %c0_47 = arith.constant 0 : index
    %c0_48 = arith.constant 0 : index
    %114 = vector.load %arg13[%c0_46, %c0_47, %c0_48] : memref<1x1x32xf32, #tpu.memory_space<vmem>>, vector<1x1x32xf32>
    %115 = vector.shape_cast %114 : vector<1x1x32xf32> to vector<1x32xf32>
    %116 = vector.broadcast %115 : vector<1x32xf32> to vector<8x32xf32>
    %117 = arith.mulf %113, %116 : vector<8x32xf32>
    %c0_49 = arith.constant 0 : index
    %c0_50 = arith.constant 0 : index
    %c0_51 = arith.constant 0 : index
    %118 = vector.load %arg14[%c0_49, %c0_50, %c0_51] : memref<1x1x32xf32, #tpu.memory_space<vmem>>, vector<1x1x32xf32>
    %119 = vector.shape_cast %118 : vector<1x1x32xf32> to vector<1x32xf32>
    %120 = vector.broadcast %119 : vector<1x32xf32> to vector<8x32xf32>
    %121 = arith.addf %117, %120 : vector<8x32xf32>
    %cst_52 = arith.constant 0.000000e+00 : f32
    %122 = vector.broadcast %cst_52 : f32 to vector<8x32xf32>
    %c0_53 = arith.constant 0 : index
    %c0_54 = arith.constant 0 : index
    %c0_55 = arith.constant 0 : index
    %123 = vector.load %arg9[%c0_53, %c0_54, %c0_55] : memref<1x32x64xf32, #tpu.memory_space<vmem>>, vector<1x32x64xf32>
    %124 = vector.shape_cast %123 : vector<1x32x64xf32> to vector<32x64xf32>
    %cst_56 = arith.constant dense<0.000000e+00> : vector<8x64xf32>
    %125 = tpu.matmul %121, %124, %cst_56 {dimension_numbers = #tpu.dot_dimension_numbers<[1], [0], [0], [1], [0, 0, 1, 1], [], []>} : vector<8x32xf32>, vector<32x64xf32>, vector<8x64xf32> -> vector<8x64xf32>
    %c0_57 = arith.constant 0 : index
    %c0_58 = arith.constant 0 : index
    %c0_59 = arith.constant 0 : index
    %126 = vector.load %arg10[%c0_57, %c0_58, %c0_59] : memref<1x1x64xf32, #tpu.memory_space<vmem>>, vector<1x1x64xf32>
    %127 = vector.shape_cast %126 : vector<1x1x64xf32> to vector<1x64xf32>
    %128 = vector.broadcast %127 : vector<1x64xf32> to vector<8x64xf32>
    %129 = arith.addf %125, %128 : vector<8x64xf32>
    %cst_60 = arith.constant 0.000000e+00 : f32
    %130 = vector.broadcast %cst_60 : f32 to vector<8x64xf32>
    %131 = arith.maximumf %129, %130 : vector<8x64xf32>
    %c0_61 = arith.constant 0 : index
    %c0_62 = arith.constant 0 : index
    %c0_63 = arith.constant 0 : index
    %132 = vector.load %arg11[%c0_61, %c0_62, %c0_63] : memref<1x64x32xf32, #tpu.memory_space<vmem>>, vector<1x64x32xf32>
    %133 = vector.shape_cast %132 : vector<1x64x32xf32> to vector<64x32xf32>
    %cst_64 = arith.constant dense<0.000000e+00> : vector<8x32xf32>
    %134 = tpu.matmul %131, %133, %cst_64 {dimension_numbers = #tpu.dot_dimension_numbers<[1], [0], [0], [1], [0, 0, 1, 1], [], []>} : vector<8x64xf32>, vector<64x32xf32>, vector<8x32xf32> -> vector<8x32xf32>
    %135 = arith.addf %122, %134 : vector<8x32xf32>
    %c0_65 = arith.constant 0 : index
    %c0_66 = arith.constant 0 : index
    %c0_67 = arith.constant 0 : index
    %136 = vector.load %arg12[%c0_65, %c0_66, %c0_67] : memref<1x1x32xf32, #tpu.memory_space<vmem>>, vector<1x1x32xf32>
    %137 = vector.shape_cast %136 : vector<1x1x32xf32> to vector<1x32xf32>
    %138 = vector.broadcast %137 : vector<1x32xf32> to vector<8x32xf32>
    %139 = arith.addf %135, %138 : vector<8x32xf32>
    %140 = arith.addf %121, %139 : vector<8x32xf32>
    %cst_68 = arith.constant dense<0.000000e+00> : vector<8xf32>
    %141 = vector.multi_reduction <add>, %140, %cst_68 [1] : vector<8x32xf32> to vector<8xf32>
    %142 = vector.shape_cast %141 : vector<8xf32> to vector<8x1xf32>
    %cst_69 = arith.constant 3.200000e+01 : f32
    %143 = vector.broadcast %cst_69 : f32 to vector<8x1xf32>
    %144 = arith.divf %142, %143 : vector<8x1xf32>
    %145 = vector.broadcast %144 : vector<8x1xf32> to vector<8x32xf32>
    %146 = arith.subf %140, %145 : vector<8x32xf32>
    %147 = arith.mulf %146, %146 : vector<8x32xf32>
    %cst_70 = arith.constant dense<0.000000e+00> : vector<8xf32>
    %148 = vector.multi_reduction <add>, %147, %cst_70 [1] : vector<8x32xf32> to vector<8xf32>
    %149 = vector.shape_cast %148 : vector<8xf32> to vector<8x1xf32>
    %cst_71 = arith.constant 3.200000e+01 : f32
    %150 = vector.broadcast %cst_71 : f32 to vector<8x1xf32>
    %151 = arith.divf %149, %150 : vector<8x1xf32>
    %152 = vector.broadcast %144 : vector<8x1xf32> to vector<8x32xf32>
    %153 = arith.subf %140, %152 : vector<8x32xf32>
    %cst_72 = arith.constant 9.99999974E-6 : f32
    %154 = vector.broadcast %cst_72 : f32 to vector<8x1xf32>
    %155 = arith.addf %151, %154 : vector<8x1xf32>
    %156 = math.rsqrt %155 : vector<8x1xf32>
    %157 = vector.broadcast %156 : vector<8x1xf32> to vector<8x32xf32>
    %158 = arith.mulf %153, %157 : vector<8x32xf32>
    %c0_73 = arith.constant 0 : index
    %c0_74 = arith.constant 0 : index
    %c0_75 = arith.constant 0 : index
    %159 = vector.load %arg15[%c0_73, %c0_74, %c0_75] : memref<1x1x32xf32, #tpu.memory_space<vmem>>, vector<1x1x32xf32>
    %160 = vector.shape_cast %159 : vector<1x1x32xf32> to vector<1x32xf32>
    %161 = vector.broadcast %160 : vector<1x32xf32> to vector<8x32xf32>
    %162 = arith.mulf %158, %161 : vector<8x32xf32>
    %c0_76 = arith.constant 0 : index
    %c0_77 = arith.constant 0 : index
    %c0_78 = arith.constant 0 : index
    %163 = vector.load %arg16[%c0_76, %c0_77, %c0_78] : memref<1x1x32xf32, #tpu.memory_space<vmem>>, vector<1x1x32xf32>
    %164 = vector.shape_cast %163 : vector<1x1x32xf32> to vector<1x32xf32>
    %165 = vector.broadcast %164 : vector<1x32xf32> to vector<8x32xf32>
    %166 = arith.addf %162, %165 : vector<8x32xf32>
    %c0_79 = arith.constant 0 : index
    %c0_80 = arith.constant 0 : index
    %167 = vector.load %arg20[%c0_79, %c0_80] : memref<8x32xf32, #tpu.memory_space<vmem>>, vector<8x32xf32>
    tpu.vector_store %arg20[%c0_79, %c0_80], %166 {strides = array<i32>} : memref<8x32xf32, #tpu.memory_space<vmem>>, vector<8x32xf32>,
    %c1_i32 = arith.constant 1 : i32
    %168 = arith.cmpi eq, %arg1, %c1_i32 : i32
    %169 = arith.extui %168 : i1 to i32
    %c0_i32_81 = arith.constant 0 : i32
    %170 = arith.cmpi ne, %169, %c0_i32_81 : i32
    scf.if %170 {
      %c0_82 = arith.constant 0 : index
      %c0_83 = arith.constant 0 : index
      %171 = vector.load %arg17[%c0_82, %c0_83] : memref<32x128xf32, #tpu.memory_space<vmem>>, vector<32x128xf32>
      %cst_84 = arith.constant dense<0.000000e+00> : vector<8x128xf32>
      %172 = tpu.matmul %166, %171, %cst_84 {dimension_numbers = #tpu.dot_dimension_numbers<[1], [0], [0], [1], [0, 0, 1, 1], [], []>} : vector<8x32xf32>, vector<32x128xf32>, vector<8x128xf32> -> vector<8x128xf32>
      %c0_85 = arith.constant 0 : index
      %c0_86 = arith.constant 0 : index
      %173 = vector.load %arg18[%c0_85, %c0_86] : memref<1x128xf32, #tpu.memory_space<vmem>>, vector<1x128xf32>
      %174 = vector.broadcast %173 : vector<1x128xf32> to vector<8x128xf32>
      %175 = arith.addf %172, %174 : vector<8x128xf32>
      %c0_87 = arith.constant 0 : index
      %c0_88 = arith.constant 0 : index
      %176 = vector.load %arg19[%c0_87, %c0_88] : memref<8x128xf32, #tpu.memory_space<vmem>>, vector<8x128xf32>
      tpu.vector_store %arg19[%c0_87, %c0_88], %175 {strides = array<i32>} : memref<8x128xf32, #tpu.memory_space<vmem>>, vector<8x128xf32>,
    } else {
    }
    return
  }
  func.func @transform_0(%arg0: i32, %arg1: i32) -> (i32, i32) {
    %c0_i32 = arith.constant 0 : i32
    %c0_i32_0 = arith.constant 0 : i32
    return %arg0, %c0_i32 : i32, i32
  }
  func.func @transform_1(%arg0: i32, %arg1: i32) -> (i32, i32) {
    %c0_i32 = arith.constant 0 : i32
    %c0_i32_0 = arith.constant 0 : i32
    %c0_i32_1 = arith.constant 0 : i32
    return %c0_i32, %c0_i32_0 : i32, i32
  }
  func.func @transform_2(%arg0: i32, %arg1: i32) -> (i32, i32) {
    %c0_i32 = arith.constant 0 : i32
    %c0_i32_0 = arith.constant 0 : i32
    %c0_i32_1 = arith.constant 0 : i32
    return %c0_i32, %c0_i32_0 : i32, i32
  }
  func.func @transform_3(%arg0: i32, %arg1: i32) -> (i32, i32, i32) {
    %c0_i32 = arith.constant 0 : i32
    %c0_i32_0 = arith.constant 0 : i32
    %c0_i32_1 = arith.constant 0 : i32
    return %arg1, %c0_i32, %c0_i32_0 : i32, i32, i32
  }
  func.func @transform_4(%arg0: i32, %arg1: i32) -> (i32, i32, i32) {
    %c0_i32 = arith.constant 0 : i32
    %c0_i32_0 = arith.constant 0 : i32
    %c0_i32_1 = arith.constant 0 : i32
    return %arg1, %c0_i32, %c0_i32_0 : i32, i32, i32
  }
  func.func @transform_5(%arg0: i32, %arg1: i32) -> (i32, i32, i32) {
    %c0_i32 = arith.constant 0 : i32
    %c0_i32_0 = arith.constant 0 : i32
    %c0_i32_1 = arith.constant 0 : i32
    return %arg1, %c0_i32, %c0_i32_0 : i32, i32, i32
  }
  func.func @transform_6(%arg0: i32, %arg1: i32) -> (i32, i32, i32) {
    %c0_i32 = arith.constant 0 : i32
    %c0_i32_0 = arith.constant 0 : i32
    %c0_i32_1 = arith.constant 0 : i32
    return %arg1, %c0_i32, %c0_i32_0 : i32, i32, i32
  }
  func.func @transform_7(%arg0: i32, %arg1: i32) -> (i32, i32, i32) {
    %c0_i32 = arith.constant 0 : i32
    %c0_i32_0 = arith.constant 0 : i32
    %c0_i32_1 = arith.constant 0 : i32
    return %arg1, %c0_i32, %c0_i32_0 : i32, i32, i32
  }
  func.func @transform_8(%arg0: i32, %arg1: i32) -> (i32, i32, i32) {
    %c0_i32 = arith.constant 0 : i32
    %c0_i32_0 = arith.constant 0 : i32
    %c0_i32_1 = arith.constant 0 : i32
    return %arg1, %c0_i32, %c0_i32_0 : i32, i32, i32
  }
  func.func @transform_9(%arg0: i32, %arg1: i32) -> (i32, i32, i32) {
    %c0_i32 = arith.constant 0 : i32
    %c0_i32_0 = arith.constant 0 : i32
    %c0_i32_1 = arith.constant 0 : i32
    return %arg1, %c0_i32, %c0_i32_0 : i32, i32, i32
  }
  func.func @transform_10(%arg0: i32, %arg1: i32) -> (i32, i32, i32) {
    %c0_i32 = arith.constant 0 : i32
    %c0_i32_0 = arith.constant 0 : i32
    %c0_i32_1 = arith.constant 0 : i32
    return %arg1, %c0_i32, %c0_i32_0 : i32, i32, i32
  }
  func.func @transform_11(%arg0: i32, %arg1: i32) -> (i32, i32, i32) {
    %c0_i32 = arith.constant 0 : i32
    %c0_i32_0 = arith.constant 0 : i32
    %c0_i32_1 = arith.constant 0 : i32
    return %arg1, %c0_i32, %c0_i32_0 : i32, i32, i32
  }
  func.func @transform_12(%arg0: i32, %arg1: i32) -> (i32, i32, i32) {
    %c0_i32 = arith.constant 0 : i32
    %c0_i32_0 = arith.constant 0 : i32
    %c0_i32_1 = arith.constant 0 : i32
    return %arg1, %c0_i32, %c0_i32_0 : i32, i32, i32
  }
  func.func @transform_13(%arg0: i32, %arg1: i32) -> (i32, i32, i32) {
    %c0_i32 = arith.constant 0 : i32
    %c0_i32_0 = arith.constant 0 : i32
    %c0_i32_1 = arith.constant 0 : i32
    return %arg1, %c0_i32, %c0_i32_0 : i32, i32, i32
  }
  func.func @transform_14(%arg0: i32, %arg1: i32) -> (i32, i32, i32) {
    %c0_i32 = arith.constant 0 : i32
    %c0_i32_0 = arith.constant 0 : i32
    %c0_i32_1 = arith.constant 0 : i32
    return %arg1, %c0_i32, %c0_i32_0 : i32, i32, i32
  }
  func.func @transform_15(%arg0: i32, %arg1: i32) -> (i32, i32) {
    %c0_i32 = arith.constant 0 : i32
    %c0_i32_0 = arith.constant 0 : i32
    %c0_i32_1 = arith.constant 0 : i32
    return %c0_i32, %c0_i32_0 : i32, i32
  }
  func.func @transform_16(%arg0: i32, %arg1: i32) -> (i32, i32) {
    %c0_i32 = arith.constant 0 : i32
    %c0_i32_0 = arith.constant 0 : i32
    %c0_i32_1 = arith.constant 0 : i32
    return %c0_i32, %c0_i32_0 : i32, i32
  }
  func.func @transform_17(%arg0: i32, %arg1: i32) -> (i32, i32) {
    %c0_i32 = arith.constant 0 : i32
    %c0_i32_0 = arith.constant 0 : i32
    return %arg0, %c0_i32 : i32, i32
  }
}

</mosaic_0001>

<bundles_post_ra>
// kernel: transformer_regressor_forward.1
= control target key start
LH: loop header
LB: loop body
LE: loop exit
PB: predicated region body
PF: predicated region fallthrough
CT: control target
= control target key end

     0   :  { %s3759_s0 = inlined_call_operand.vmem [shape: f32[16,4], index: 0, kind: input, shape index: {}]   ;;  %s3760_s1 = inlined_call_operand.vmem [shape: f32[4,32], index: 1, kind: input, shape index: {}]   ;;  %s3761_s2 = inlined_call_operand.hbm [shape: f32[1,32], index: 2, kind: input, shape index: {}]   ;;  %s3762_s3 = inlined_call_operand.vmem [shape: f32[2,32,96], index: 3, kind: input, shape index: {}]   ;;  %s3763_s4 = inlined_call_operand.vmem [shape: f32[2,1,96], index: 4, kind: input, shape index: {}]   ;;  %s3764_s5 = inlined_call_operand.vmem [shape: f32[2,32,32], index: 5, kind: input, shape index: {}]   ;;  %s3765_s6 = inlined_call_operand.vmem [shape: f32[2,1,32], index: 6, kind: input, shape index: {}]   ;;  %s3766_s7 = inlined_call_operand.vmem [shape: f32[2,32,64], index: 7, kind: input, shape index: {}]   ;;  %s3767_s8 = inlined_call_operand.vmem [shape: f32[2,1,64], index: 8, kind: input, shape index: {}]   ;;  %s3768_s9 = inlined_call_operand.vmem [shape: f32[2,64,32], index: 9, kind: input, shape index: {}]   ;;  %s3769_s10 = inlined_call_operand.vmem [shape: f32[2,1,32], index: 10, kind: input, shape index: {}]   ;;  %s3770_s11 = inlined_call_operand.vmem [shape: f32[2,1,32], index: 11, kind: input, shape index: {}]   ;;  %s3771_s12 = inlined_call_operand.vmem [shape: f32[2,1,32], index: 12, kind: input, shape index: {}]   ;;  %s3772_s13 = inlined_call_operand.hbm [shape: f32[2,1,32], index: 13, kind: input, shape index: {}]   ;;  %s3773_s14 = inlined_call_operand.hbm [shape: f32[2,1,32], index: 14, kind: input, shape index: {}]   ;;  %s3774_s15 = inlined_call_operand.hbm [shape: f32[32,128], index: 15, kind: input, shape index: {}]   ;;  %s3775_s16 = inlined_call_operand.hbm [shape: f32[1,128], index: 16, kind: input, shape index: {}]   ;;  %s3776_s17 = inlined_call_operand.vmem [shape: f32[16,128], index: 17, kind: output, shape index: {}]  }
   0x1   :  { %3792 = sst [smem:[#allocation22_spill]] %s3759_s0 }
   0x2   :  { %3793 = sst [smem:[#allocation23_spill]] %s3760_s1 }
   0x3   :  { %3794 = sst [smem:[#allocation24_spill]] %s3761_s2 }
   0x4   :  { %3795 = sst [smem:[#allocation25_spill]] %s3762_s3 }
   0x5   :  { %3796 = sst [smem:[#allocation26_spill]] %s3764_s5 }
   0x6   :  { %3797 = sst [smem:[#allocation27_spill]] %s3765_s6 }
   0x7   :  { %3798 = sst [smem:[#allocation28_spill]] %s3766_s7 }
   0x8   :  { %3799 = sst [smem:[#allocation29_spill]] %s3767_s8 }
   0x9   :  { %3800 = sst [smem:[#allocation30_spill]] %s3768_s9 }
   0xa   :  { %3801 = sst [smem:[#allocation31_spill]] %s3769_s10 }
   0xb   :  { %3802 = sst [smem:[#allocation32_spill]] %s3770_s11 }
   0xc   :  { %3803 = sst [smem:[#allocation33_spill]] %s3771_s12 }
   0xd   :  { %3804 = sst [smem:[#allocation34_spill]] %s3772_s13 }
   0xe   :  { %3805 = sst [smem:[#allocation35_spill]] %s3773_s14 }
   0xf   :  { %3806 = sst [smem:[#allocation36_spill]] %s3774_s15 }
  0x10   :  { %3807 = sst [smem:[#allocation37_spill]] %s3775_s16 }
  0x11   :  { %3808 = sst [smem:[#allocation38_spill]] %s3776_s17 }
  0x12   :  { %22 = vsyncpa [#allocation4], 0 }
  0x13   :  { %23 = vsyncpa [#allocation6], 0 }
  0x14   :  { %25 = vsyncpa [#allocation6 + $0x1], 0 }
  0x15   :  { %26 = vsyncpa [#allocation9], 0  ;;  %s3274_s24 = smov 0   ;;  %s3276_s25 = smov 0  }
  0x16   :  { %s3278_s26 = smov 0   ;;  %s3280_s27 = smov 0  }
  0x17   :  { %s3282_s28 = smov 0   ;;  %s3284_s29 = smov 0  }
  0x18   :  { %s3286_s0 = smov 0   ;;  %s3288_s30 = smov 0  }
  0x19 LB: > { %3809 = sst [smem:[#allocation14_spill]] %s3132_s25  ;;  %s3777_s18 = sadd.s32 4294967295, %s3156_s30   ;;  %s3156_s30 = sphi %s3288_s30, %s32_s30   ;;  %s3152_s0 = sphi %s3286_s0, %s3863_s0   ;;  %s3148_s29 = sphi %s3284_s29, %s3862_s29   ;;  %s3144_s28 = sphi %s3282_s28, %s3861_s28   ;;  %s3140_s27 = sphi %s3280_s27, %s3860_s27   ;;  %s3136_s26 = sphi %s3278_s26, %s3859_s26   ;;  %s3132_s25 = sphi %s3276_s25, %s3858_s25   ;;  %s3128_s24 = sphi %s3274_s24, %s3857_s24  }
  0x1a   : > { %3810 = sst [smem:[#allocation15_spill]] %s3136_s26  ;;  %p392_p0 = scmp.ne.s32.totalorder %s3132_s25, %s3128_s24 }
  0x1b   : > { %3811 = sst [smem:[#allocation16_spill]] %s3148_s29  ;;  %p3316_p1 = scmp.eq.s32.totalorder %s3777_s18, 0 }
  0x1c   : > { %3812 = sst [smem:[#allocation17_spill]] %s3152_s0  ;;  %p2532_p2 = scmp.ge.s32.totalorder %s3156_s30, 1 }
  0x1d   : > { %3813 = sst [smem:[#allocation18_spill]] %s3156_s30  ;;  %p497_p3 = scmp.lt.s32.totalorder %s3156_s30, 5 }
  0x1e   : > { %s3814_s19 = scalar_select %p3316_p1, 1, 0 }
  0x1f   : > { %p3324_p4 = por %p3316_p1, %p392_p0  ;;  %p3328_p5 = pnand %p2532_p2, %p497_p3 }
  0x20   : > { %s3158_s21 = smov [#allocation8]   ;;  %s3818_s15 = sld [smem:[#allocation36_spill]] }
  0x21   : > { %s3815_s1 = scalar_select %p3324_p4, 1, 0 }
  0x22   : > { %s3816_s20 = scalar_select %p3328_p5, 1, 0 }
  0x23   : > { %s523_s22 = sshll.u32 %s3158_s21, 4  ;;  %p2806_p6 = pneg %p3328_p5  ;;  %s524_s22 = int_to_ptr.vmem [resolvable:$true] %s523_s22 }
  0x25   : > { %p3336_p7 = pnand %p2806_p6, %p3316_p1 }
  0x26   : > { %s2938_s17 = scalar_lea.hbm %s3818_s15, 512 }
  0x27   : > { %s3817_s23 = scalar_select %p3336_p7, 1, 0 }
  0x28   : > { %p2939_p8 = scmp.ne.s32.totalorder %s3818_s15, %s2938_s17  ;;  %p3348_p9 = pneg %p3336_p7 }
  0x29   : > { %p2945_p12 = scmp.lt.u32.totalorder %s2938_s17, %s3818_s15 }
  0x2a   : > { %p2941_p10 = pnand %p3348_p9, %p2939_p8 }
  0x2c   : > { %p2942_p11 = pneg %p2941_p10 }
  0x2e   : > { %p2947_p13 = pnand %p2945_p12, %p2942_p11 }
  0x30   : > { %2950 = shalt.err (!%p2947_p13)
}
  0x31   : > { %s2951_s18 = scalar_lea.vmem %s524_s22, 512  ;;  %p2959_p6 = scmp.lt.s32.totalorder %s524_s22, %s524_s22 }
  0x32   : > { %p2952_p0 = scmp.ne.s32.totalorder %s524_s22, %s2951_s18  ;;  %p2960_p4 = scmp.lt.s32.totalorder %s2951_s18, %s2951_s18 }
  0x34   : > { %p2954_p2 = pnand %p2952_p0, %p3348_p9  ;;  %p2961_p1 = por %p2960_p4, %p2959_p6 }
  0x36   : > { %p2955_p3 = pneg %p2954_p2 }
  0x38   : > { %p2962_p5 = pnand %p2961_p1, %p2955_p3 }
  0x3a   : > { %2965 = shalt.err (!%p2962_p5)
}
  0x3b   : > { %s3159_s11 = smov 128   ;;  %s3160_s9 = smov 8  }
  0x3c   : > { %2812 = dma.hbm_to_vmem [thread:$0]  (!%p3336_p7), %s3818_s15, 512, %s524_s22, [#allocation9], %s3159_s11, %s3159_s11, %s3160_s9  }
  0x3d   : > { %s41_s17 = sadd.s32 1, %s3148_s29  ;;  %s44_s24 = sadd.s32 1, %s3152_s0 }
  0x3e   : > { %p42_p1 = scmp.ge.s32.totalorder %s41_s17, 2  ;;  %s379_s18 = sadd.s32 1, %s3136_s26 }
  0x3f   : > { %p386_p4 = scmp.ne.s32.totalorder %s3136_s26, %s3132_s25  ;;  %p387_p5 = scmp.eq.s32.totalorder %s3156_s30, 0 }
  0x40   : > { %s3865_s17 = smov (%p42_p1, %s41_s17), 0  ;;  %s3867_s24 = smov (!%p42_p1, %s44_s24), %s3152_s0 }
  0x41   : > { %3820 = sst [smem:[#allocation19_spill]] %s3865_s17  ;;  %s376_s8 = ssub.s32 %s3148_s29, %s3865_s17 }
  0x42   : > { %p46_p8 = scmp.ge.s32.totalorder %s3867_s24, 2  ;;  %p377_p10 = scmp.eq.s32.totalorder %s376_s8, 0 }
  0x43   : > { %p388_p11 = por %p387_p5, %p386_p4  ;;  %p2826_p12 = scmp.lt.s32.totalorder %s3156_s30, 4 }
  0x44   : > { %s3869_s24 = smov (%p46_p8, %s3867_s24), 0  ;;  %s623_s11 = sand.u32 1, %s3156_s30  }
  0x45   : > { %3821 = sst [smem:[#allocation20_spill]] %s3869_s24  ;;  %s3783_s9 = sand.u32 1, %s3136_s26  }
  0x46   : > { %s3379_s22 = scalar_select %p377_p10, %s3136_s26, %s379_s18  }
  0x47   : > { %s2537_s10 = sshll.u32 %s3148_s29, 4  ;;  %s626_s12 = scalar_lea.vmem [#allocation5], %s3783_s9 }
  0x48   : > { %3822 = sst [smem:[#allocation21_spill]] %s3379_s22  ;;  %s633_s15 = sshll.u32 %s626_s12, 4  ;;  %s3391_s15 = int_to_ptr.vmem [resolvable:$true] %s633_s15 }
  0x49   : > { %s3823_s13 = sld [smem:[#allocation34_spill]]  ;;  %p3393_p13 = pnand %p2826_p12, %p388_p11 }
  0x4a   : > { %s3825_s14 = sld [smem:[#allocation35_spill]]  ;;  %s3402_s6 = scalar_lea.sflag [#allocation6], %s623_s11 }
  0x4b   : > { %p3788_p2 = pneg %p3393_p13 }
  0x4f   : > { %s3389_s0 = scalar_lea.hbm %s3823_s13, %s2537_s10  ;;  %s2971_s29 = scalar_lea.hbm %s3823_s13, 32 }
  0x50   : > { %s3400_s12 = scalar_lea.hbm %s3825_s14, %s2537_s10  ;;  %s2966_s7 = scalar_lea.hbm %s3389_s0, 16 }
  0x51   : > { %p2967_p0 = scmp.ne.s32.totalorder %s3389_s0, %s2966_s7  ;;  %p2972_p1 = scmp.lt.u32.totalorder %s3389_s0, %s3823_s13 }
  0x52   : > { %p2973_p4 = scmp.lt.u32.totalorder %s2971_s29, %s2966_s7  ;;  %p2975_p8 = scmp.lt.u32.totalorder %s2966_s7, %s3389_s0 }
  0x53   : > { %p2969_p3 = pnand %p3788_p2, %p2967_p0 }
  0x54   : > { %p2974_p5 = por %p2973_p4, %p2972_p1 }
  0x55   : > { %p2970_p6 = pneg %p2969_p3 }
  0x56   : > { %p2976_p10 = por %p2975_p8, %p2974_p5 }
  0x58   : > { %p2977_p11 = pnand %p2976_p10, %p2970_p6 }
  0x5a   : > { %2980 = shalt.err (!%p2977_p11)
}
  0x5b   : > { %s2981_s11 = scalar_lea.vmem %s3391_s15, 16  ;;  %s3161_s17 = smov [#allocation5]  }
  0x5c   : > { %p2982_p12 = scmp.ne.s32.totalorder %s3391_s15, %s2981_s11  ;;  %s2986_s9 = sshll.u32 %s3161_s17, 4  ;;  %s2987_s9 = int_to_ptr.vmem [resolvable:$false] %s2986_s9 }
  0x5d   : > { %s2988_s22 = scalar_lea.vmem %s2987_s9, 32  ;;  %p2989_p7 = scmp.lt.s32.totalorder %s3391_s15, %s2987_s9 }
  0x5e   : > { %p2984_p0 = pnand %p2982_p12, %p3788_p2  ;;  %p2990_p1 = scmp.lt.s32.totalorder %s2988_s22, %s2981_s11 }
  0x60   : > { %p2985_p3 = pneg %p2984_p0  ;;  %p2991_p4 = por %p2990_p1, %p2989_p7 }
  0x62   : > { %p2992_p5 = pnand %p2991_p4, %p2985_p3 }
  0x64   : > { %2995 = shalt.err (!%p2992_p5)
}
  0x65   : > { %2819 = dma.hbm_to_vmem [thread:$0]  (!%p3393_p13), %s3389_s0, 16, %s3391_s15, %s3402_s6  }
  0x66   : > { %s3162_s29 = smov [#allocation3]   ;;  %s3163_s18 = smov [#allocation10]  }
  0x67   : > { %s513_s10 = sshll.u32 %s3162_s29, 4  ;;  %s537_s7 = sshll.u32 %s3163_s18, 4  ;;  %s514_s10 = int_to_ptr.vmem [resolvable:$true] %s513_s10  ;;  %s3430_s7 = int_to_ptr.vmem [resolvable:$true] %s537_s7 }
  0x68   : > { %s3826_s2 = sld [smem:[#allocation24_spill]] }
  0x6e   : > { %s2996_s11 = scalar_lea.hbm %s3826_s2, 16 }
  0x6f   : > { %p2997_p7 = scmp.ne.s32.totalorder %s3826_s2, %s2996_s11  ;;  %p3003_p10 = scmp.lt.u32.totalorder %s2996_s11, %s3826_s2 }
  0x71   : > { %p2999_p6 = pnand %p2997_p7, %p3348_p9 }
  0x73   : > { %p3000_p8 = pneg %p2999_p6 }
  0x75   : > { %p3005_p11 = pnand %p3003_p10, %p3000_p8 }
  0x77   : > { %3008 = shalt.err (!%p3005_p11)
}
  0x78   : > { %s3009_s0 = scalar_lea.vmem %s514_s10, 16  ;;  %s3016_s29 = scalar_lea.vmem %s514_s10, 32 }
  0x79   : > { %p3010_p12 = scmp.ne.s32.totalorder %s514_s10, %s3009_s0  ;;  %p3017_p1 = scmp.lt.s32.totalorder %s514_s10, %s514_s10 }
  0x7a   : > { %p3018_p4 = scmp.lt.s32.totalorder %s3016_s29, %s3009_s0 }
  0x7b   : > { %p3012_p0 = pnand %p3010_p12, %p3348_p9 }
  0x7c   : > { %p3019_p5 = por %p3018_p4, %p3017_p1 }
  0x7d   : > { %p3013_p3 = pneg %p3012_p0 }
  0x7f   : > { %p3020_p2 = pnand %p3019_p5, %p3013_p3 }
  0x81   : > { %3023 = shalt.err (!%p3020_p2)
}
  0x82   : > { %p3827_p7 = scmp.ne.s32.totalorder %s3817_s23, 0  ;;  %s3828_s16 = sld [smem:[#allocation37_spill]] }
  0x84   : > { %2809 = dma.hbm_to_vmem [thread:$0]  (!%p3827_p7), %s3826_s2, 16, %s514_s10, [#allocation4]  }
  0x88   : > { %s3024_s11 = scalar_lea.hbm %s3828_s16, 16 }
  0x89   : > { %p3025_p6 = scmp.ne.s32.totalorder %s3828_s16, %s3024_s11  ;;  %p3031_p2 = scmp.lt.u32.totalorder %s3024_s11, %s3828_s16 }
  0x8b   : > { %p3027_p8 = pnand %p3025_p6, %p3348_p9 }
  0x8d   : > { %p3028_p10 = pneg %p3027_p8 }
  0x8f   : > { %p3033_p11 = pnand %p3031_p2, %p3028_p10 }
  0x91   : > { %3036 = shalt.err (!%p3033_p11)
}
  0x92   : > { %s3037_s10 = scalar_lea.vmem %s3430_s7, 16  ;;  %s3044_s29 = scalar_lea.vmem %s3430_s7, 32 }
  0x93   : > { %p3038_p12 = scmp.ne.s32.totalorder %s3430_s7, %s3037_s10  ;;  %p3045_p1 = scmp.lt.s32.totalorder %s3430_s7, %s3430_s7 }
  0x94   : > { %p3046_p4 = scmp.lt.s32.totalorder %s3044_s29, %s3037_s10 }
  0x95   : > { %p3040_p0 = pnand %p3038_p12, %p3348_p9 }
  0x96   : > { %p3047_p5 = por %p3046_p4, %p3045_p1 }
  0x97   : > { %p3041_p3 = pneg %p3040_p0 }
  0x99   : > { %p3048_p6 = pnand %p3047_p5, %p3041_p3 }
  0x9b   : > { %3051 = shalt.err (!%p3048_p6)
}
  0x9c   : > { %2815 = dma.hbm_to_vmem [thread:$0]  (!%p3827_p7), %s3828_s16, 16, %s3430_s7, [#allocation9]  }
  0x9d   : > { %s3829_s21 = sand.u32 1, %s3136_s26   ;;  %s3052_s11 = scalar_lea.hbm %s3400_s12, 16 }
  0x9e   : > { %s643_s13 = scalar_lea.vmem [#allocation7], %s3829_s21  ;;  %p3053_p9 = scmp.ne.s32.totalorder %s3400_s12, %s3052_s11 }
  0x9f   : > { %s650_s17 = sshll.u32 %s643_s13, 4  ;;  %p3830_p8 = pneg %p3393_p13  ;;  %s651_s17 = int_to_ptr.vmem [resolvable:$true] %s650_s17 }
  0xa0   : > { %s3057_s22 = scalar_lea.hbm %s3825_s14, 32  ;;  %p3058_p11 = scmp.lt.u32.totalorder %s3400_s12, %s3825_s14 }
  0xa1   : > { %p3055_p10 = pnand %p3053_p9, %p3830_p8  ;;  %p3059_p12 = scmp.lt.u32.totalorder %s3057_s22, %s3052_s11 }
  0xa2   : > { %p3061_p0 = scmp.lt.u32.totalorder %s3052_s11, %s3400_s12 }
  0xa3   : > { %p3056_p2 = pneg %p3055_p10  ;;  %p3060_p7 = por %p3059_p12, %p3058_p11 }
  0xa5   : > { %p3062_p3 = por %p3061_p0, %p3060_p7 }
  0xa7   : > { %p3063_p1 = pnand %p3062_p3, %p3056_p2 }
  0xa9   : > { %3066 = shalt.err (!%p3063_p1)
}
  0xaa   : > { %s3067_s7 = scalar_lea.vmem %s651_s17, 16  ;;  %p3831_p5 = pmov %p3830_p8 }
  0xab   : > { %p3068_p4 = scmp.ne.s32.totalorder %s651_s17, %s3067_s7  ;;  %s3164_s10 = smov [#allocation7]  }
  0xac   : > { %s3072_s29 = sshll.u32 %s3164_s10, 4  ;;  %s3073_s29 = int_to_ptr.vmem [resolvable:$false] %s3072_s29 }
  0xad   : > { %p3070_p6 = pnand %p3068_p4, %p3831_p5  ;;  %s3074_s18 = scalar_lea.vmem %s3073_s29, 32 }
  0xae   : > { %p3075_p8 = scmp.lt.s32.totalorder %s651_s17, %s3073_s29  ;;  %p3076_p10 = scmp.lt.s32.totalorder %s3074_s18, %s3067_s7 }
  0xaf   : > { %p3071_p9 = pneg %p3070_p6 }
  0xb0   : > { %p3077_p11 = por %p3076_p10, %p3075_p8 }
  0xb2   : > { %p3078_p12 = pnand %p3077_p11, %p3071_p9 }
  0xb4   : > { %3081 = shalt.err (!%p3078_p12)
}
  0xb5   : > { %2822 = dma.hbm_to_vmem [thread:$0]  (!%p3393_p13), %s3400_s12, 16, %s651_s17, %s3402_s6  }
  0xb6   : > { %p3832_p2 = scmp.ne.s32.totalorder %s3816_s20, 0 }
  0xb7   : > { %p3833_p7 = scmp.ne.s32.totalorder (!%p3832_p2), %s3814_s19, 0 }
  0xb8   : > { %659 = sbr.rel (%p3832_p2) target bundleno = 4282 (0x10ba), region = 88 }
  0xbf   : > { %3115 = dma.done.wait (%p3833_p7), [#allocation4], 16  }
  0xc0   : > { %3117 = vsyncadd (%p3833_p7), [#allocation4], 4294967280  ;;  %s3834_s24 = sadd.s32 4294967295, %s3156_s30   ;;  %s667_s13 = sand.u32 1, %s3132_s25  }
  0xc1   : > { %s665_s21 = sand.u32 1, %s3834_s24   ;;  %s3505_s8 = scalar_lea.vmem [#allocation5], %s667_s13 }
  0xc2   : > { %s666_s11 = scalar_lea.sflag [#allocation6], %s665_s21  ;;  %p3835_p0 = scmp.ne.s32.totalorder %s3815_s1, 0 }
  0xc4   : > { %3119 = dma.done.wait (%p3835_p0), %s666_s11, 32  }
  0xc5   : > { %3121 = vsyncadd (%p3835_p0), %s666_s11, 4294967264  ;;  %s3511_s20 = scalar_lea.vmem [#allocation7], %s667_s13 }
  0xc6   : > { %3123 = dma.done.wait (%p3833_p7), [#allocation9], 528  }
  0xc7   : > { %3125 = vsyncadd (%p3833_p7), [#allocation9], 4294966768  ;;  %p779_p13 = scmp.lt.s32.totalorder %s3144_s28, 1  ;;  %p783_p3 = scmp.lt.s32.totalorder %s3140_s27, 1 }
  0xc8   : > { %s3836_s17 = sld [smem:[#allocation22_spill]]  ;;  %s3837_s3 = sld [smem:[#allocation25_spill]] }
  0xc9   : > { %s3871_s28 = smov (!%p779_p13, %s3144_s28), 1  ;;  %s3838_s5 = sld [smem:[#allocation26_spill]] }
  0xca   : > { %s3521_s12 = scalar_select %p783_p3, %s3140_s27, 1 }
  0xcb   : > { %s2543_s1 = sshll.u32 %s3871_s28, 3  ;;  %s3840_s2 = sld [smem:[#allocation28_spill]] }
  0xcc   : > { %s2589_s9 = sshll.u32 %s3521_s12, 5  ;;  %s2592_s7 = sshll.u32 %s3521_s12, 6 }
  0xcd   : > { %s3842_s26 = sld [smem:[#allocation31_spill]]  ;;  %s3843_s25 = sld [smem:[#allocation30_spill]] }
  0xce   : > { %s782_s23 = scalar_lea.vmem %s3836_s17, %s2543_s1  ;;  %s3530_s0 = scalar_lea.vmem %s3837_s3, %s2589_s9 }
  0xcf   : > { %s3539_s21 = scalar_lea.vmem %s3838_s5, %s2589_s9  ;;  %s3844_s11 = sld [smem:[#allocation32_spill]] }
  0xd0   : > { %s3845_s17 = sld [smem:[#allocation33_spill]]  ;;  %s3846_s15 = sld [smem:[#allocation38_spill]] }
  0xd1   : > { %s3548_s14 = scalar_lea.vmem %s3840_s2, %s2589_s9  ;;  %p2553_p1 = scmp.ne.s32.totalorder %s3140_s27, 0 }
  0xd2   : > { %vm842_vm0 = vcmask (!%p2553_p1), 1043456   ;;  %v829_v1 = vld [vmem:[%s782_s23] sm:$0xff] (!%p2553_p1)  ;;  %v3165_v2 = vmov (!%p2553_p1), 0.0   ;;  %vm3166_vm1 = vmmov (!%p2553_p1), 0   ;;  %vm838_vm2 = vcmask (!%p2553_p1), 31744  }
  0xd3   : > { %s814_s18 = scalar_lea.vmem %s3842_s26, %s3521_s12  ;;  %s3562_s30 = scalar_lea.vmem %s3843_s25, %s2592_s7  ;;  %2643 = vmatprep.subr.mxu0 (!%p2553_p1), %v3165_v2  ;;  %2645 = vmatprep.mubr.msk.f32.mxu0 (!%p2553_p1), %vm3166_vm1, %v3165_v2  ;;  %v2554_v3 = vld [vmem:[#allocation3] ss:$0 sm:$0xff] (!%p2553_p1)  ;;  %vm916_vm3 = vcmask (!%p2553_p1), 261120  }
  0xd4   : > { %828 = sbr.rel (%p2553_p1) target bundleno = 435 (0x1b3), region = 112  ;;  %s3847_s25 = sld [smem:[#allocation23_spill]] (!%p2553_p1) }
  0xd5   : > { %s817_s6 = scalar_lea.vmem %s3844_s11, %s3521_s12 }
  0xd6   : > { %s820_s19 = scalar_lea.vmem %s3845_s17, %s3521_s12  ;;  %s3575_s16 = scalar_lea.vmem %s3846_s15, %s2543_s1 }
  0xda   : > { %v830_v0 = vld [vmem:[%s3847_s25] sm:$0xf] (!%p2553_p1) }
  0xdb   : > { %2644 = vmatpush3.msk.msra.mxu0 %vm842_vm0, %v830_v0 }
  0xdc   : > { %2646 = vmatmul.mubr.msk.f32.vlgmr.msra.gmra.mrb[0].mxu0 %vm838_vm2, %v829_v1 }
 0x1af   : > { %v912_v4 = vpop.f32.mrb[0].mxu0 }
 0x1b0   : > { %v913_v5 = vadd.f32 %v2554_v3, %v912_v4  ;;  %v2647_v6 = vpop.f32.mrb[1].mxu0 }
 0x1b2   : > { %917 = vst.msk [vmem:[#allocation2] sm:$0xff] %vm916_vm3, %v913_v5 }
 0x1b3 PF: > { %v919_v7 = vld [vmem:[%s3530_s0] sm:$0xff]  ;;  %v920_v8 = vld [vmem:[%s3530_s0 + $0x8] sm:$0xff]  ;;  %v921_v9 = vld [vmem:[%s3530_s0 + $0x10] sm:$0xff]  ;;  %v3167_v10 = vmov 0.0|0.0   ;;  %vm3168_vm4 = vmmov 0   ;;  %v3169_v13 = vmov 0.0  }
 0x1b4   : > { %2760 = vmatprep.subr.bf16.mxu0 %v3167_v10  ;;  %v2761_v11 = vpack.c.bf16 %v920_v8, %v919_v7  ;;  %v922_v12 = vld [vmem:[%s3530_s0 + $0x18] sm:$0xff]  ;;  %2656 = vmatprep.mubr.msk.f32.mxu0 %vm3168_vm4, %v3169_v13  ;;  %vm930_vm5 = vcmask 261120   ;;  %s3848_s0 = scalar_lea.vmem %s3763_s4, %s3521_s12  ;;  %s3170_s29 = smov 120   ;;  %vm1007_vm6 = vcmask 64512   ;;  %v1335_v39 = vld [vmem:[%s3539_s21 + $0x8] sm:$0xff]  ;;  %v1169_v48 = vld [vmem:[%s3539_s21] sm:$0xff] }
 0x1b5   : > { %2664 = vmatprep.subr.mxu1 %v3169_v13  ;;  %2666 = vmatprep.mubr.msk.f32.mxu1 %vm3168_vm4, %v3169_v13  ;;  %v2764_v14 = vpack.c.bf16 %v922_v12, %v921_v9  ;;  %v2557_v16 = vld [vmem:[%s3848_s0] ss:$0 sm:$0xff]  ;;  %s3171_s7 = smov 96   ;;  %s3172_s10 = smov 88   ;;  %vm2101_vm7 = vcmask 523264  }
 0x1b6   : > { %2762 = vmatpush3.bf16.msra.mxu0 %v2761_v11  ;;  %s3173_s24 = smov 56   ;;  %s3174_s28 = smov 64   ;;  %v1647_v11 = vld [vmem:[%s3539_s21 + $0x10] sm:$0xff] }
 0x1b7   : > { %2763 = vmatprep.subr.bf16.mxu0 %v3167_v10  ;;  %s3175_s13 = smov 80   ;;  %s3176_s11 = smov 112  }
 0x1b8   : > { %s3177_s2 = smov 72   ;;  %s3178_s9 = smov 104  }
 0x1b9   : > { %v3592_v15 = vld [vmem:[#allocation2] sm:$0xff]  ;;  %s3179_s17 = smov 48   ;;  %s3180_s22 = smov 40  }
 0x1ba   : > { %2765 = vmatpush3.bf16.msra.mxu0 %v2764_v14  ;;  %s3849_s15 = sld [smem:[#allocation27_spill]]  ;;  %p2584_p4 = scmp.ne.s32.totalorder %s3140_s27, 1 }
 0x1bb   : > { %2659 = vmatprep.subr.mxu0 %v3169_v13  ;;  %vm3182_vm8 = vmmov (!%p2584_p4), 0  }
 0x1bd   : > { %2657 = vmatmul.mubr.msk.f32.vlgmr.msra.gmra.mrb[0].mxu0 %vm930_vm5, %v3592_v15 }
 0x1be   : > { %2661 = vmatprep.mubr.msk.f32.mxu0 %vm3168_vm4, %v3169_v13 }
 0x1c0   : > { %s3850_s26 = scalar_lea.vmem %s3849_s15, %s3521_s12 }
 0x290   : > { %v1000_v17 = vpop.f32.mrb[0].mxu0 }
 0x291   : > { %v3604_v18 = vadd.f32 %v2557_v16, %v1000_v17  ;;  %v2658_v19 = vpop.f32.mrb[1].mxu0 }
 0x293   : > { %1170 = vrot.lane.b32.xlu1 %v3604_v18, %s3170_s29  ;;  %1005 = vrot.lane.b32.xlu0 %v3604_v18, %s3171_s7 }
 0x297   : > { %1172 = vrot.lane.b32.xlu0 %v3604_v18, %s3172_s10  ;;  %s3853_s10 = sld [smem:[#allocation29_spill]] }
 0x305   : > { %v1006_v20 = vpop.permute.xlu0 %1005  ;;  %v1171_v22 = vpop.permute.xlu1 %1170 }
 0x306   : > { %2660 = vmatpush3.xpose.msk.msra.mxu0 %vm1007_vm6, %v1006_v20 }
 0x307   : > { %2669 = vmatprep.subr.mxu0 %v3169_v13 }
 0x309   : > { %2662 = vmatmul.mubr.msk.f32.vlgmr.msra.gmra.mrb[2].mxu0 %vm1007_vm6, %v3604_v18  ;;  %v1173_v21 = vpop.permute.xlu0 %1172 }
 0x30a   : > { %2670 = vmatpush3.xpose.msk.msra.mxu0 %vm1007_vm6, %v1173_v21  ;;  %2671 = vmatprep.mubr.msk.f32.mxu0 %vm3168_vm4, %v3169_v13 }
 0x30b   : > { %2679 = vmatprep.subr.mxu0 %v3169_v13 }
 0x30d   : > { %2672 = vmatmul.mubr.msk.f32.vlgmr.msra.gmra.mrb[4].mxu0 %vm1007_vm6, %v1171_v22 }
 0x30e   : > { %2681 = vmatprep.mubr.msk.f32.mxu0 %vm3168_vm4, %v3169_v13  ;;  %2680 = vmatpush3.msra.mxu0 %v1335_v39 }
 0x30f   : > { %2689 = vmatprep.subr.mxu0 %v3169_v13 }
 0x3dc   : > { %v1078_v23 = vpop.f32.mrb[2].mxu0 }
 0x3dd   : > { %v2663_v24 = vpop.f32.mrb[3].mxu0  ;;  %v1082_v25 = vsel %vm1007_vm6, %v1078_v23, -inf }
 0x3de   : > { %1083 = vmax.xlane.f32.xlu1 %v1082_v25 }
 0x3e0   : > { %v1244_v26 = vpop.f32.mrb[4].mxu0 }
 0x3e1   : > { %v2673_v27 = vpop.f32.mrb[5].mxu0  ;;  %v1248_v28 = vsel %vm1007_vm6, %v1244_v26, -inf }
 0x3e2   : > { %1249 = vmax.xlane.f32.xlu0 %v1248_v28 }
 0x46b   : > { %v1084_v29 = vpop.xlane.xlu1 %1083 }
 0x46c   : > { %v1085_v30 = vsub.f32 %v1078_v23, %v1084_v29 }
 0x46e   : > { %v1086_v31 = vmul.f32 1.442695, %v1085_v30 }
 0x46f   : > { %v1250_v32 = vpop.xlane.xlu0 %1249 }
 0x470   : > { %2918 = vpow2.f32 %v1086_v31  ;;  %v1251_v33 = vsub.f32 %v1244_v26, %v1250_v32  ;;  %v1887_v26 = vld [vmem:[%s3539_s21 + $0x18] sm:$0xff] }
 0x472   : > { %v1252_v34 = vmul.f32 1.442695, %v1251_v33 }
 0x474   : > { %2920 = vpow2.f32 %v1252_v34 }
 0x47a   : > { %v2919_v35 = vpop.eup %2918 }
 0x47b   : > { %v1088_v36 = vsel %vm1007_vm6, %v2919_v35, 0.0 }
 0x47c   : > { %1089 = vadd.xlane.f32.xlu0 %v1088_v36 }
 0x47e   : > { %v2921_v37 = vpop.eup %2920 }
 0x47f   : > { %v1254_v38 = vsel %vm1007_vm6, %v2921_v37, 0.0 }
 0x480   : > { %1255 = vadd.xlane.f32.xlu1 %v1254_v38 }
 0x491   : > { %1259 = vrot.lane.b32.xlu1 %v3604_v18, %s3173_s24  ;;  %s3854_s24 = scalar_lea.vmem %s3853_s10, %s3521_s12 }
 0x492   : > { %1093 = vrot.lane.b32.xlu0 %v3604_v18, %s3174_s28 }
 0x495   : > { %1484 = vrot.lane.b32.xlu1 %v3604_v18, %s3175_s13 }
 0x496   : > { %1482 = vrot.lane.b32.xlu0 %v3604_v18, %s3176_s11 }
 0x509   : > { %v1090_v40 = vpop.xlane.xlu0 %1089 }
 0x50a   : > { %2922 = vrcp.f32 %v1090_v40 }
 0x50d   : > { %v1256_v41 = vpop.xlane.xlu1 %1255  ;;  %v1094_v42 = vpop.permute.xlu0 %1093 }
 0x50e   : > { %2924 = vrcp.f32 %v1256_v41  ;;  %2665 = vmatpush3.msra.mxu1 %v1094_v42 }
 0x50f   : > { %2674 = vmatprep.subr.mxu1 %v3169_v13 }
 0x511   : > { %v1260_v45 = vpop.permute.xlu1 %1259  ;;  %v1483_v54 = vpop.permute.xlu0 %1482 }
 0x514   : > { %v2923_v43 = vpop.eup %2922 }
 0x515   : > { %v1092_v44 = vmul.f32 %v2923_v43, %v2919_v35  ;;  %v1485_v52 = vpop.permute.xlu1 %1484  ;;  %v2575_v35 = vld [vmem:[%s3850_s26] ss:$0 sm:$0xff] }
 0x517   : > { %2667 = vmatmul.mubr.msk.f32.vlgmr.msra.gmra.mrb[0].mxu1 %vm1007_vm6, %v1092_v44 }
 0x518   : > { %v2925_v46 = vpop.eup %2924  ;;  %2675 = vmatpush3.msra.mxu1 %v1260_v45  ;;  %2676 = vmatprep.mubr.msk.f32.mxu1 %vm3168_vm4, %v3169_v13  ;;  %v2001_v45 = vld [vmem:[%s3548_s14] sm:$0xff] }
 0x519   : > { %v1258_v47 = vmul.f32 %v2925_v46, %v2921_v37  ;;  %2684 = vmatprep.subr.mxu1 %v3169_v13  ;;  %v2002_v46 = vld [vmem:[%s3548_s14 + $0x8] sm:$0xff] }
 0x51b   : > { %2677 = vmatmul.mubr.msk.f32.vlgmr.msra.gmra.mrb[2].mxu1 %vm1007_vm6, %v1258_v47  ;;  %v2767_v47 = vpack.c.bf16 %v2002_v46, %v2001_v45 }
 0x51c   : > { %2686 = vmatprep.mubr.msk.f32.mxu1 %vm3168_vm4, %v3169_v13  ;;  %2685 = vmatpush3.msra.mxu1 %v1169_v48  ;;  %v2004_v48 = vld [vmem:[%s3548_s14 + $0x18] sm:$0xff] }
 0x51d   : > { %2694 = vmatprep.subr.mxu1 %v3169_v13 }
 0x5ea   : > { %v1165_v49 = vpop.f32.mrb[0].mxu1 }
 0x5eb   : > { %v2668_v50 = vpop.f32.mrb[1].mxu1  ;;  %2687 = vmatmul.mubr.msk.f32.vlgmr.msra.gmra.mrb[4].mxu1 %vm1007_vm6, %v1165_v49 }
 0x5ec   : > { %2696 = vmatprep.mubr.msk.f32.mxu1 %vm3168_vm4, %v3169_v13  ;;  %v2086_v50 = vld [vmem:[%s3562_s30] sm:$0xff] }
 0x5ee   : > { %v1331_v51 = vpop.f32.mrb[2].mxu1 }
 0x5ef   : > { %v2678_v53 = vpop.f32.mrb[3].mxu1  ;;  %2682 = vmatmul.mubr.msk.f32.vlgmr.msra.gmra.mrb[6].mxu0 %vm1007_vm6, %v1331_v51  ;;  %v2087_v51 = vld [vmem:[%s3562_s30 + $0x8] sm:$0xff] }
 0x5f0   : > { %2690 = vmatpush3.xpose.msk.msra.mxu0 %vm1007_vm6, %v1485_v52  ;;  %2691 = vmatprep.mubr.msk.f32.mxu0 %vm3168_vm4, %v3169_v13  ;;  %v2088_v52 = vld [vmem:[%s3562_s30 + $0x10] sm:$0xff]  ;;  %v2773_v53 = vpack.c.bf16 %v2087_v51, %v2086_v50 }
 0x5f1   : > { %2699 = vmatprep.subr.mxu0 %v3169_v13 }
 0x5f3   : > { %2692 = vmatmul.mubr.msk.f32.vlgmr.msra.gmra.mrb[8].mxu0 %vm1007_vm6, %v1483_v54  ;;  %v2089_v54 = vld [vmem:[%s3562_s30 + $0x18] sm:$0xff] }
 0x5f4   : > { %2701 = vmatprep.mubr.msk.f32.mxu0 %vm3168_vm4, %v3169_v13  ;;  %2700 = vmatpush3.msra.mxu0 %v1647_v11 }
 0x5f5   : > { %2709 = vmatprep.subr.mxu0 %v3169_v13 }
 0x6be   : > { %v1478_v55 = vpop.f32.mrb[4].mxu1 }
 0x6bf   : > { %v2688_v56 = vpop.f32.mrb[5].mxu1 }
 0x6c0   : > { %v2090_v56 = vld [vmem:[%s3562_s30 + $0x20] sm:$0xff] }
 0x6c2   : > { %v1405_v57 = vpop.f32.mrb[6].mxu0 }
 0x6c3   : > { %v1479_v58 = vadd.f32 %v1478_v55, %v1405_v57  ;;  %v2683_v59 = vpop.f32.mrb[7].mxu0  ;;  %v2776_v55 = vpack.c.bf16 %v2089_v54, %v2088_v52  ;;  %v2091_v57 = vld [vmem:[%s3562_s30 + $0x28] sm:$0xff] }
 0x6c6   : > { %v1556_v60 = vpop.f32.mrb[8].mxu0 }
 0x6c7   : > { %v2693_v61 = vpop.f32.mrb[9].mxu0  ;;  %v1560_v62 = vsel %vm1007_vm6, %v1556_v60, -inf }
 0x6c8   : > { %1561 = vmax.xlane.f32.xlu1 %v1560_v62 }
 0x6d9   : > { %1724 = vrot.lane.b32.xlu1 %v3604_v18, %s3177_s2 }
 0x6dd   : > { %1722 = vrot.lane.b32.xlu1 %v3604_v18, %s3178_s9 }
 0x755   : > { %v1562_v63 = vpop.xlane.xlu1 %1561 }
 0x756   : > { %v1563_v0 = vsub.f32 %v1556_v60, %v1562_v63  ;;  %v2576_v63 = vld [vmem:[%s817_s6] ss:$0 sm:$0xff] }
 0x758   : > { %v1564_v1 = vmul.f32 1.442695, %v1563_v0 }
 0x759   : > { %v1725_v7 = vpop.permute.xlu1 %1724 }
 0x75a   : > { %2926 = vpow2.f32 %v1564_v1  ;;  %v2577_v1 = vld [vmem:[%s820_s19] ss:$0 sm:$0xff] }
 0x75d   : > { %v1723_v9 = vpop.permute.xlu1 %1722 }
 0x764   : > { %v2927_v2 = vpop.eup %2926 }
 0x765   : > { %v1566_v3 = vsel %vm1007_vm6, %v2927_v2, 0.0 }
 0x766   : > { %1567 = vadd.xlane.f32.xlu0 %v1566_v3  ;;  %v2092_v3 = vld [vmem:[%s3562_s30 + $0x30] sm:$0xff] }
 0x77c   : > { %1571 = vrot.lane.b32.xlu0 %v3604_v18, %s3179_s17 }
 0x7f3   : > { %v1568_v4 = vpop.xlane.xlu0 %1567 }
 0x7f4   : > { %2928 = vrcp.f32 %v1568_v4  ;;  %v2093_v4 = vld [vmem:[%s3562_s30 + $0x38] sm:$0xff] }
 0x7f7   : > { %v1572_v5 = vpop.permute.xlu0 %1571 }
 0x7f8   : > { %2695 = vmatpush3.msra.mxu1 %v1572_v5  ;;  %v2782_v5 = vpack.c.bf16 %v2093_v4, %v2092_v3 }
 0x7f9   : > { %2704 = vmatprep.subr.mxu1 %v3169_v13 }
 0x7fe   : > { %v2929_v6 = vpop.eup %2928 }
 0x7ff   : > { %v1570_v8 = vmul.f32 %v2929_v6, %v2927_v2  ;;  %v2578_v6 = vld [vmem:[%s3854_s24] ss:$0 sm:$0xff] }
 0x801   : > { %2697 = vmatmul.mubr.msk.f32.vlgmr.msra.gmra.mrb[6].mxu1 %vm1007_vm6, %v1570_v8 }
 0x802   : > { %2705 = vmatpush3.xpose.msk.msra.mxu1 %vm1007_vm6, %v1725_v7  ;;  %2706 = vmatprep.mubr.msk.f32.mxu1 %vm3168_vm4, %v3169_v13 }
 0x803   : > { %2714 = vmatprep.subr.mxu1 %v3169_v13 }
 0x805   : > { %2707 = vmatmul.mubr.msk.f32.vlgmr.msra.gmra.mrb[8].mxu1 %vm1007_vm6, %v1723_v9 }
 0x806   : > { %2716 = vmatprep.mubr.msk.f32.mxu1 %vm3168_vm4, %v3169_v13  ;;  %2715 = vmatpush3.msra.mxu1 %v1887_v26 }
 0x807   : > { %2772 = vmatprep.subr.bf16.mxu1 %v3167_v10 }
 0x8d4   : > { %v1643_v12 = vpop.f32.mrb[6].mxu1 }
 0x8d5   : > { %v2698_v14 = vpop.f32.mrb[7].mxu1  ;;  %2702 = vmatmul.mubr.msk.f32.vlgmr.msra.gmra.mrb[10].mxu0 %vm1007_vm6, %v1643_v12  ;;  %v2580_v12 = vld [vmem:[%s814_s18] ss:$0 sm:$0xff] }
 0x8d6   : > { %2711 = vmatprep.mubr.msk.f32.mxu0 %vm3168_vm4, %v3169_v13 }
 0x8d8   : > { %v1796_v16 = vpop.f32.mrb[8].mxu1 }
 0x8d9   : > { %v2708_v17 = vpop.f32.mrb[9].mxu1  ;;  %v1800_v19 = vsel %vm1007_vm6, %v1796_v16, -inf }
 0x8da   : > { %1801 = vmax.xlane.f32.xlu0 %v1800_v19 }
 0x8f0   : > { %1811 = vrot.lane.b32.xlu0 %v3604_v18, %s3180_s22 }
 0x967   : > { %v1802_v20 = vpop.xlane.xlu0 %1801 }
 0x968   : > { %v1803_v21 = vsub.f32 %v1796_v16, %v1802_v20 }
 0x96a   : > { %v1804_v22 = vmul.f32 1.442695, %v1803_v21 }
 0x96b   : > { %v1812_v23 = vpop.permute.xlu0 %1811 }
 0x96c   : > { %2930 = vpow2.f32 %v1804_v22  ;;  %2710 = vmatpush3.msra.mxu0 %v1812_v23 }
 0x96d   : > { %2766 = vmatprep.subr.bf16.mxu0 %v3167_v10 }
 0x976   : > { %v2931_v24 = vpop.eup %2930 }
 0x977   : > { %v1806_v25 = vsel %vm1007_vm6, %v2931_v24, 0.0 }
 0x978   : > { %1807 = vadd.xlane.f32.xlu1 %v1806_v25 }
 0x9a8   : > { %v1717_v27 = vpop.f32.mrb[10].mxu0 }
 0x9a9   : > { %v1721_v28 = vadd.f32 %v1717_v27, %v1479_v58  ;;  %v2703_v18 = vpop.f32.mrb[11].mxu0  ;;  %v2779_v58 = vpack.c.bf16 %v2091_v57, %v2090_v56 }
 0xa05   : > { %v1808_v29 = vpop.xlane.xlu1 %1807 }
 0xa06   : > { %2932 = vrcp.f32 %v1808_v29  ;;  %v2582_v29 = vld [vmem:[%s3505_s8] ss:$0 sm:$0xff] }
 0xa10   : > { %v2933_v30 = vpop.eup %2932 }
 0xa11   : > { %v1810_v31 = vmul.f32 %v2933_v30, %v2931_v24 }
 0xa13   : > { %2712 = vmatmul.mubr.msk.f32.vlgmr.msra.gmra.mrb[12].mxu0 %vm1007_vm6, %v1810_v31  ;;  %v2583_v31 = vld [vmem:[%s3511_s20] ss:$0 sm:$0xff] }
 0xa14   : > { %2727 = vmatprep.mubr.msk.f32.mxu0 %vm3168_vm4, %v3169_v13  ;;  %2768 = vmatpush3.bf16.msra.mxu0 %v2767_v47 }
 0xa15   : > { %2769 = vmatprep.subr.bf16.mxu0 %v3167_v10 }
 0xae6   : > { %v1883_v32 = vpop.f32.mrb[12].mxu0 }
 0xae7   : > { %v2713_v33 = vpop.f32.mrb[13].mxu0  ;;  %2717 = vmatmul.mubr.msk.f32.vlgmr.msra.gmra.mrb[10].mxu1 %vm1007_vm6, %v1883_v32 }
 0xae8   : > { %2746 = vmatprep.mubr.msk.f32.mxu1 %vm3168_vm4, %v3169_v13  ;;  %2774 = vmatpush3.bf16.msra.mxu1 %v2773_v53 }
 0xae9   : > { %2775 = vmatprep.subr.bf16.mxu1 %v3167_v10 }
 0xaec   : > { %2777 = vmatpush3.bf16.msra.mxu1 %v2776_v55 }
 0xaed   : > { %2778 = vmatprep.subr.bf16.mxu1 %v3167_v10 }
 0xaf0   : > { %2780 = vmatpush3.bf16.msra.mxu1 %v2779_v58 }
 0xaf1   : > { %2781 = vmatprep.subr.bf16.mxu1 %v3167_v10 }
 0xaf4   : > { %2783 = vmatpush3.bf16.msra.mxu1 %v2782_v5 }
 0xbba   : > { %v1957_v34 = vpop.f32.mrb[10].mxu1 }
 0xbbb   : > { %v1961_v36 = vadd.f32 %v1957_v34, %v1721_v28  ;;  %v2718_v37 = vpop.f32.mrb[11].mxu1  ;;  %v2210_v34 = vld [vmem:[#allocation8] sm:$0xff] (!%p2584_p4) }
 0xbbc   : > { %v3181_v37 = vmov (!%p2584_p4), 0.0|0.0  }
 0xbbd   : > { %v1969_v38 = vadd.f32 %v2575_v35, %v1961_v36  ;;  %v2211_v35 = vld [vmem:[#allocation8 + $0x8] sm:$0xff] (!%p2584_p4)  ;;  %v2212_v36 = vld [vmem:[#allocation8 + $0x10] sm:$0xff] (!%p2584_p4) }
 0xbbf   : > { %v1970_v39 = vadd.f32 %v1969_v38, %v3592_v15  ;;  %v2003_v15 = vld [vmem:[%s3548_s14 + $0x10] sm:$0xff]  ;;  %v2785_v38 = vpack.c.bf16 (!%p2584_p4), %v2211_v35, %v2210_v34 }
 0xbc0   : > { %v2770_v49 = vpack.c.bf16 %v2004_v48, %v2003_v15 }
 0xbc1   : > { %v1971_v40 = vsel %vm930_vm5, %v1970_v39, 0.0 }
 0xbc2   : > { %1972 = vadd.xlane.f32.xlu1 %v1971_v40  ;;  %2771 = vmatpush3.bf16.msra.mxu0 %v2770_v49  ;;  %v3183_v40 = vmov (!%p2584_p4), 0.0  }
 0xbc3   : > { %2784 = vmatprep.subr.bf16.mxu0 (!%p2584_p4), %v3181_v37 }
 0xc4f   : > { %v1973_v41 = vpop.xlane.xlu1 %1972 }
 0xc50   : > { %v1975_v13 = vmul.f32 0.03125, %v1973_v41 }
 0xc52   : > { %v1976_v42 = vsub.f32 %v1970_v39, %v1975_v13  ;;  %v2213_v39 = vld [vmem:[#allocation8 + $0x18] sm:$0xff] (!%p2584_p4)  ;;  %v2585_v13 = vld [vmem:[#allocation10] ss:$0 sm:$0xff] (!%p2584_p4) }
 0xc53   : > { %v2788_v41 = vpack.c.bf16 (!%p2584_p4), %v2213_v39, %v2212_v36 }
 0xc54   : > { %v1977_v43 = vmul.f32 %v1976_v42, %v1976_v42 }
 0xc56   : > { %v1978_v44 = vsel %vm930_vm5, %v1977_v43, 0.0 }
 0xc57   : > { %1979 = vadd.xlane.f32.xlu1 %v1978_v44 }
 0xce4   : > { %v1980_v59 = vpop.xlane.xlu1 %1979 }
 0xce5   : > { %v1981_v60 = vmul.f32 0.03125, %v1980_v59 }
 0xce7   : > { %v1982_v61 = vadd.f32 1e-05, %v1981_v60 }
 0xce9   : > { %2934 = vrsqrt.f32 %v1982_v61 }
 0xcf3   : > { %v2935_v62 = vpop.eup %2934 }
 0xcf4   : > { %v1984_v0 = vmul.f32 %v2935_v62, %v1976_v42 }
 0xcf6   : > { %v1992_v2 = vmul.f32 %v2576_v63, %v1984_v0 }
 0xcf8   : > { %v2000_v10 = vadd.f32 %v2577_v1, %v1992_v2 }
 0xcfa   : > { %2728 = vmatmul.mubr.msk.f32.vlgmr.msra.gmra.mrb[14].mxu0 %vm930_vm5, %v2000_v10 }
 0xcfb   : > { %2757 = vmatprep.mubr.msk.f32.mxu0 (!%p2584_p4), %vm3182_vm8, %v3183_v40  ;;  %2786 = vmatpush3.bf16.msra.mxu0 (!%p2584_p4), %v2785_v38 }
 0xcfc   : > { %2787 = vmatprep.subr.bf16.mxu0 (!%p2584_p4), %v3181_v37 }
 0xcff   : > { %2789 = vmatpush3.bf16.msra.mxu0 (!%p2584_p4), %v2788_v41 }
 0xdcd   : > { %v2081_v7 = vpop.f32.mrb[14].mxu0 }
 0xdce   : > { %v2082_v8 = vadd.f32 %v2578_v6, %v2081_v7  ;;  %v2729_v9 = vpop.f32.mrb[15].mxu0 }
 0xdd0   : > { %v2085_v11 = vmax.f32 %v2082_v8, 0.0 }
 0xdd2   : > { %2747 = vmatmul.mubr.msk.f32.vlgmr.msra.gmra.mrb[12].mxu1 %vm2101_vm7, %v2085_v11 }
 0xea5   : > { %v2171_v14 = vpop.f32.mrb[12].mxu1 }
 0xea6   : > { %v2172_v16 = vadd.f32 %v2580_v12, %v2171_v14  ;;  %v2748_v17 = vpop.f32.mrb[13].mxu1 }
 0xea8   : > { %v2175_v19 = vadd.f32 %v2172_v16, %v2000_v10 }
 0xeaa   : > { %v2176_v20 = vsel %vm930_vm5, %v2175_v19, 0.0 }
 0xeab   : > { %2177 = vadd.xlane.f32.xlu1 %v2176_v20 }
 0xf38   : > { %v2178_v21 = vpop.xlane.xlu1 %2177 }
 0xf39   : > { %v2179_v22 = vmul.f32 0.03125, %v2178_v21 }
 0xf3b   : > { %v2180_v23 = vsub.f32 %v2175_v19, %v2179_v22 }
 0xf3d   : > { %v2181_v24 = vmul.f32 %v2180_v23, %v2180_v23 }
 0xf3f   : > { %v2182_v25 = vsel %vm930_vm5, %v2181_v24, 0.0 }
 0xf40   : > { %2183 = vadd.xlane.f32.xlu1 %v2182_v25 }
 0xfcd   : > { %v2184_v26 = vpop.xlane.xlu1 %2183 }
 0xfce   : > { %v2185_v27 = vmul.f32 0.03125, %v2184_v26 }
 0xfd0   : > { %v2186_v28 = vadd.f32 1e-05, %v2185_v27 }
 0xfd2   : > { %2936 = vrsqrt.f32 %v2186_v28 }
 0xfdc   : > { %v2937_v18 = vpop.eup %2936 }
 0xfdd   : > { %v2188_v30 = vmul.f32 %v2937_v18, %v2180_v23  ;;  %2209 = sbr.rel (%p2584_p4) target bundleno = 4282 (0x10ba), region = 116 }
 0xfdf   : > { %v2196_v32 = vmul.f32 %v2582_v29, %v2188_v30 }
 0xfe1   : > { %v2204_v33 = vadd.f32 %v2583_v31, %v2196_v32 }
 0xfe3   : > { %2205 = vst.msk [vmem:[#allocation2] sm:$0xff] %vm930_vm5, %v2204_v33  ;;  %2758 = vmatmul.mubr.msk.f32.vlgmr.msra.gmra.mrb[0].mxu0 (!%p2584_p4), %vm930_vm5, %v2204_v33 }
0x10b6   : > { %v2290_v42 = vpop.f32.mrb[0].mxu0 }
0x10b7   : > { %v2291_v43 = vadd.f32 %v2585_v13, %v2290_v42  ;;  %v2759_v44 = vpop.f32.mrb[1].mxu0 }
0x10b9   : > { %2294 = vst [vmem:[%s3575_s16] sm:$0xff] %v2291_v43 }
0x10ba PF: > { %s3856_s27 = sld [smem:[#allocation18_spill]]  ;;  %s3857_s24 = sld [smem:[#allocation14_spill]] }
0x10bb   : > { %s3858_s25 = sld [smem:[#allocation15_spill]]  ;;  %s3859_s26 = sld [smem:[#allocation21_spill]] }
0x10bc   : > { %s3861_s28 = sld [smem:[#allocation17_spill]]  ;;  %s3862_s29 = sld [smem:[#allocation19_spill]] }
0x10bd   : > { %s3863_s0 = sld [smem:[#allocation20_spill]] }
0x10c0   : > { %s32_s30 = sadd.s32 1, %s3856_s27   ;;  %s3860_s27 = sld [smem:[#allocation16_spill]] }
0x10c1   : > { %p29_p5 = scmp.ge.s32.totalorder %s32_s30, 6  }
0x10c3   :  { %31 = sbr.rel (!%p29_p5) target bundleno = 25 (0x19), region = 193 }
0x10ca   :  { %2314 = vsyncpa [#allocation4], 1 }
0x10cb   :  { %2316 = vsyncpa [#allocation4 + $0x1], 1 }
0x10cc   :  { %2317 = vsyncpa [#allocation6], 1 }
0x10cd   :  { %2319 = vsyncpa [#allocation6 + $0x1], 1 }
0x10ce   :  { %2320 = vsyncpa [#allocation9], 1 }

</bundles_post_ra>
